<compile_context>
chip_gen: v7x
topology: tpu7x:2x2x1
jax: 0.10.0
libtpu: 0.0.40
codegen_flags: <defaults>
</compile_context>

<pallas_src>
import jax
import jax.numpy as jnp
import numpy as np
from jax import lax
from jax.experimental import pallas as pl
from jax.experimental.pallas import tpu as pltpu

BATCH = 2
T = 8              # num_traj_states
D = 4              # state_dim
N = T * D          # flattened trajectory dimension (factors.get_N()) = 32
M = 48             # total number of factor constraints (factors.get_num_constraints())
NA = N + BATCH     # augmented width: [U0 | AtK @ b]  = 34
NP = 8             # panel size for block Gauss-Jordan (4 panels)
DELTA = 0.1        # OptimParams.reg regularization


def _plan_kernel(th_ref, h_ref, mu_ref, k_ref, dth_ref, err_ref, aug_ref):
    # th_ref : (B, N)    lane-dense trajectories
    # h_ref  : (M, N)    shared Jacobian
    # mu_ref : (1, M)    shared linearization target (row)
    # k_ref  : (M, M)    shared SPD inverse covariance
    # dth_ref: (B, N)    output trajectory updates
    # err_ref: (B, M)    output linearized factor errors
    # aug_ref: (N, NA)   VMEM scratch used ONCE to assemble the augmented tile
    f32 = jnp.float32
    Th = th_ref[...]
    H = h_ref[...]
    mu = mu_ref[...]
    K = k_ref[...]

    # Per-batch linearized error, lane-dense:  Err = Th @ H^T - mu          (B, M)
    Err = lax.dot_general(Th, H, (((1,), (1,)), ((), ())),
                          preferred_element_type=f32) - mu
    err_ref[...] = Err

    # ---- batch-invariant factorization pieces (computed once) ----
    # AtK = H^T @ K                                                         (N, M)
    AtK = lax.dot_general(H, K, (((0,), (0,)), ((), ())),
                          preferred_element_type=f32)
    ri = lax.broadcasted_iota(jnp.int32, (N, N), 0)
    ci = lax.broadcasted_iota(jnp.int32, (N, N), 1)
    eye_n = (ri == ci).astype(f32)
    # U0 = A^T K A + delta * I                                              (N, N)
    U0 = jnp.dot(AtK, H, preferred_element_type=f32) + DELTA * eye_n
    # Right-hand sides for every batch element: rhs = AtK @ b               (N, B)
    RHS = lax.dot_general(AtK, Err, (((1,), (1,)), ((), ())),
                          preferred_element_type=f32)

    # Assemble the augmented tile [U0 | RHS] once through VMEM (single round trip,
    # sidesteps an in-kernel concatenate); all further GJ state stays in vregs.
    aug_ref[:, 0:N] = U0
    aug_ref[:, N:NA] = RHS
    aug = aug_ref[...]                                                      # (N, NA)

    # Block Gauss-Jordan, no pivoting (safe: U0 is SPD + delta*I, every running
    # Schur-complement pivot >= delta = 0.1).  Per 8-row panel: an unrolled 8-step
    # mini elimination on the 1-vreg panel value (equivalent to left-multiplying the
    # panel by Dinv), then a single rank-8 MXU update of the whole augmented tile.
    sub_p = lax.broadcasted_iota(jnp.int32, (NP, 1), 0)      # (NP, 1) sublane index
    row_i = lax.broadcasted_iota(jnp.int32, (N, NP), 0)      # (N, NP)
    col_i = lax.broadcasted_iota(jnp.int32, (N, NP), 1)      # (N, NP)
    for p in range(N // NP):
        k0 = p * NP
        panel = aug[k0:k0 + NP, :]                            # (NP, NA) current panel rows
        for j in range(NP):
            c = k0 + j                                        # pivot column (static)
            prow = panel[j:j + 1, :]                          # (1, NA) pivot row
            piv = prow[:, c:c + 1]                            # (1, 1)  pivot (>= delta)
            inv0 = pl.reciprocal(piv, approx=True)            # EUP vrcp
            inv_p = inv0 * (2.0 - piv * inv0)                 # one Newton refinement
            prow_n = prow * inv_p                             # (1, NA) normalized pivot row
            colc = panel[:, c:c + 1]                          # (NP, 1) pivot column
            # rank-1 eliminate + fold normalized pivot row in with a sublane select
            panel = jnp.where(sub_p == j, prow_n, panel - colc * prow_n)
        # panel == Dinv @ aug[k0:k0+NP, :]   (its diagonal block is now identity)
        ek = ((row_i - col_i) == k0).astype(f32)              # (N, NP): 1 at (k0+i, i)
        cprime = aug[:, k0:k0 + NP] - ek                      # (N, NP)
        # single rank-8 update: panel rows become `panel`, other rows get eliminated
        aug = aug - jnp.dot(cprime, panel, preferred_element_type=f32)

    # Solution columns X = aug[:, N:NA]  (N, B);  dth[b, :] = X[:, b].
    X = aug[:, N:NA]
    bi = lax.broadcasted_iota(jnp.int32, (BATCH, BATCH), 0)
    bj = lax.broadcasted_iota(jnp.int32, (BATCH, BATCH), 1)
    eye_b = (bi == bj).astype(f32)
    # transposing matmul on the (otherwise idle) MXU instead of a tiny XLU transpose
    dth_ref[...] = lax.dot_general(eye_b, X, (((1,), (1,)), ((), ())),
                                   preferred_element_type=f32)


def plan_layer_forward(thb, H, mu, Kmat):
    """Pallas implementation of PlanLayer.forward: returns (dthetab, last_error)."""
    B, T_, D_ = thb.shape
    assert (B, T_, D_) == (BATCH, T, D)
    th_rows = thb.reshape(B, N).astype(jnp.float32)
    mu_row = mu.reshape(1, M).astype(jnp.float32)

    dth, err = pl.pallas_call(
        _plan_kernel,
        out_shape=(jax.ShapeDtypeStruct((B, N), jnp.float32),
                   jax.ShapeDtypeStruct((B, M), jnp.float32)),
        grid_spec=pltpu.PrefetchScalarGridSpec(
            num_scalar_prefetch=0,
            grid=(1,),                                    # whole batch in one step
            in_specs=[
                pl.BlockSpec((B, N), lambda i: (0, 0)),   # trajectories (lane-dense rows)
                pl.BlockSpec((M, N), lambda i: (0, 0)),   # shared Jacobian H
                pl.BlockSpec((1, M), lambda i: (0, 0)),   # shared target mu (row)
                pl.BlockSpec((M, M), lambda i: (0, 0)),   # shared inv covariance K
            ],
            out_specs=[
                pl.BlockSpec((B, N), lambda i: (0, 0)),
                pl.BlockSpec((B, M), lambda i: (0, 0)),
            ],
            scratch_shapes=[
                pltpu.VMEM((N, NA), jnp.float32),         # one-shot augmented-tile assembly
            ],
        ),
        compiler_params=pltpu.CompilerParams(
            dimension_semantics=("arbitrary",)),
    )(th_rows, H.astype(jnp.float32), mu_row, Kmat.astype(jnp.float32))

    dthetab = dth.reshape(B, T_, D_)
    last_error = {"synthetic_factor": err.reshape(B, M, 1)}   # errors dict
    return dthetab, last_error


if __name__ == "__main__":
    key = jax.random.PRNGKey(0)
    k1, k2, k3, k4 = jax.random.split(key, 4)

    thb = jax.random.normal(k1, (BATCH, T, D), dtype=jnp.float32)
    # Deterministic synthetic linearized factor graph parameters.
    H = 0.1 * jax.random.normal(k2, (M, N), dtype=jnp.float32)
    mu = 0.1 * jax.random.normal(k3, (M, 1), dtype=jnp.float32)
    C = jax.random.normal(k4, (M, M), dtype=jnp.float32) / jnp.sqrt(M)
    Kmat = 0.5 * (C @ C.T) + 0.5 * jnp.eye(M, dtype=jnp.float32)   # SPD inverse covariance

    dthetab, last_error = plan_layer_forward(thb, H, mu, Kmat)
    dthetab = jax.block_until_ready(dthetab)
    err_k = jax.block_until_ready(last_error["synthetic_factor"])

    # float64 numpy reference of construct/solve_linear_system_batch for a sanity check.
    th_n = np.asarray(thb, dtype=np.float64).reshape(BATCH, N)
    H_n = np.asarray(H, dtype=np.float64)
    mu_n = np.asarray(mu, dtype=np.float64).reshape(1, M)
    K_n = np.asarray(Kmat, dtype=np.float64)
    b_n = th_n @ H_n.T - mu_n                                      # (B, M)
    AtK_n = H_n.T @ K_n                                            # (N, M)
    utu_n = AtK_n @ H_n + DELTA * np.eye(N)                        # (N, N)
    ref = np.stack([np.linalg.solve(utu_n, AtK_n @ b_n[i]) for i in range(BATCH)])
    ref = ref.reshape(BATCH, T, D)

    dth_np = np.asarray(dthetab, dtype=np.float64)
    err_np = np.asarray(err_k, dtype=np.float64).reshape(BATCH, M)
    assert np.allclose(dth_np, ref, rtol=5e-3, atol=5e-3), \
        float(np.max(np.abs(dth_np - ref)))
    assert np.allclose(err_np, b_n, rtol=1e-3, atol=1e-3), \
        float(np.max(np.abs(err_np - b_n)))

    print("KERNEL_OK")
</pallas_src>

<mosaic_0001>
module attributes {stable_mosaic.version = 11 : i64} {
  func.func @_plan_kernel(%arg0: i32, %arg1: memref<2x32xf32, #tpu.memory_space<vmem>>, %arg2: memref<48x32xf32, #tpu.memory_space<vmem>>, %arg3: memref<1x48xf32, #tpu.memory_space<vmem>>, %arg4: memref<48x48xf32, #tpu.memory_space<vmem>>, %arg5: memref<2x32xf32, #tpu.memory_space<vmem>>, %arg6: memref<2x48xf32, #tpu.memory_space<vmem>>, %arg7: memref<32x34xf32, #tpu.memory_space<vmem>>) attributes {dimension_semantics = [#tpu.dimension_semantics<arbitrary>], iteration_bounds = array<i64: 1>, scalar_prefetch = 0 : i64, scratch_operands = 1 : i64, tpu.core_type = #tpu.core_type<tc>, window_params = [{pipeline_mode = #tpu.pipeline_mode<synchronous>, transform_indices = @transform_0, window_bounds = array<i64: 2, 32>}, {pipeline_mode = #tpu.pipeline_mode<synchronous>, transform_indices = @transform_1, window_bounds = array<i64: 48, 32>}, {pipeline_mode = #tpu.pipeline_mode<synchronous>, transform_indices = @transform_2, window_bounds = array<i64: 1, 48>}, {pipeline_mode = #tpu.pipeline_mode<synchronous>, transform_indices = @transform_3, window_bounds = array<i64: 48, 48>}, {pipeline_mode = #tpu.pipeline_mode<synchronous>, transform_indices = @transform_4, window_bounds = array<i64: 2, 32>}, {pipeline_mode = #tpu.pipeline_mode<synchronous>, transform_indices = @transform_5, window_bounds = array<i64: 2, 48>}]} {
    %c0 = arith.constant 0 : index
    %c0_0 = arith.constant 0 : index
    %0 = vector.load %arg1[%c0, %c0_0] : memref<2x32xf32, #tpu.memory_space<vmem>>, vector<2x32xf32>
    %c0_1 = arith.constant 0 : index
    %c0_2 = arith.constant 0 : index
    %1 = vector.load %arg2[%c0_1, %c0_2] : memref<48x32xf32, #tpu.memory_space<vmem>>, vector<48x32xf32>
    %c0_3 = arith.constant 0 : index
    %c0_4 = arith.constant 0 : index
    %2 = vector.load %arg3[%c0_3, %c0_4] : memref<1x48xf32, #tpu.memory_space<vmem>>, vector<1x48xf32>
    %c0_5 = arith.constant 0 : index
    %c0_6 = arith.constant 0 : index
    %3 = vector.load %arg4[%c0_5, %c0_6] : memref<48x48xf32, #tpu.memory_space<vmem>>, vector<48x48xf32>
    %cst = arith.constant dense<0.000000e+00> : vector<2x48xf32>
    %4 = tpu.matmul %0, %1, %cst {dimension_numbers = #tpu.dot_dimension_numbers<[1], [1], [0], [0], [0, 0, 1, 0], [], []>} : vector<2x32xf32>, vector<48x32xf32>, vector<2x48xf32> -> vector<2x48xf32>
    %5 = vector.broadcast %2 : vector<1x48xf32> to vector<2x48xf32>
    %6 = arith.subf %4, %5 : vector<2x48xf32>
    %c0_7 = arith.constant 0 : index
    %c0_8 = arith.constant 0 : index
    %7 = vector.load %arg6[%c0_7, %c0_8] : memref<2x48xf32, #tpu.memory_space<vmem>>, vector<2x48xf32>
    tpu.vector_store %arg6[%c0_7, %c0_8], %6 {strides = array<i32>} : memref<2x48xf32, #tpu.memory_space<vmem>>, vector<2x48xf32>,
    %cst_9 = arith.constant dense<0.000000e+00> : vector<32x48xf32>
    %8 = tpu.matmul %1, %3, %cst_9 {dimension_numbers = #tpu.dot_dimension_numbers<[0], [0], [1], [1], [0, 1, 1, 1], [], []>} : vector<48x32xf32>, vector<48x48xf32>, vector<32x48xf32> -> vector<32x48xf32>
    %9 = tpu.iota {dimensions = array<i32: 0>} : vector<32x32xi32>
    %10 = tpu.iota {dimensions = array<i32: 1>} : vector<32x32xi32>
    %11 = arith.cmpi eq, %9, %10 : vector<32x32xi32>
    %12 = arith.extui %11 : vector<32x32xi1> to vector<32x32xi32>
    %13 = arith.sitofp %12 : vector<32x32xi32> to vector<32x32xf32>
    %cst_10 = arith.constant dense<0.000000e+00> : vector<32x32xf32>
    %14 = tpu.matmul %8, %1, %cst_10 {dimension_numbers = #tpu.dot_dimension_numbers<[1], [0], [0], [1], [0, 0, 1, 1], [], []>} : vector<32x48xf32>, vector<48x32xf32>, vector<32x32xf32> -> vector<32x32xf32>
    %cst_11 = arith.constant 1.000000e-01 : f32
    %15 = vector.broadcast %cst_11 : f32 to vector<32x32xf32>
    %16 = arith.mulf %15, %13 : vector<32x32xf32>
    %17 = arith.addf %14, %16 : vector<32x32xf32>
    %cst_12 = arith.constant dense<0.000000e+00> : vector<32x2xf32>
    %18 = tpu.matmul %8, %6, %cst_12 {dimension_numbers = #tpu.dot_dimension_numbers<[1], [1], [0], [0], [0, 0, 1, 0], [], []>} : vector<32x48xf32>, vector<2x48xf32>, vector<32x2xf32> -> vector<32x2xf32>
    %c0_13 = arith.constant 0 : index
    %c0_14 = arith.constant 0 : index
    %19 = vector.load %arg7[%c0_13, %c0_14] : memref<32x34xf32, #tpu.memory_space<vmem>>, vector<32x32xf32>
    tpu.vector_store %arg7[%c0_13, %c0_14], %17 {strides = array<i32>} : memref<32x34xf32, #tpu.memory_space<vmem>>, vector<32x32xf32>,
    %c0_15 = arith.constant 0 : index
    %c32 = arith.constant 32 : index
    %20 = vector.load %arg7[%c0_15, %c32] : memref<32x34xf32, #tpu.memory_space<vmem>>, vector<32x2xf32>
    tpu.vector_store %arg7[%c0_15, %c32], %18 {strides = array<i32>} : memref<32x34xf32, #tpu.memory_space<vmem>>, vector<32x2xf32>,
    %c0_16 = arith.constant 0 : index
    %c0_17 = arith.constant 0 : index
    %21 = vector.load %arg7[%c0_16, %c0_17] : memref<32x34xf32, #tpu.memory_space<vmem>>, vector<32x34xf32>
    %22 = tpu.iota {dimensions = array<i32: 0>} : vector<8x1xi32>
    %23 = tpu.iota {dimensions = array<i32: 0>} : vector<32x8xi32>
    %24 = tpu.iota {dimensions = array<i32: 1>} : vector<32x8xi32>
    %25 = vector.extract_strided_slice %21 {offsets = [0, 0], sizes = [8, 34], strides = [1, 1]} : vector<32x34xf32> to vector<8x34xf32>
    %26 = vector.extract_strided_slice %25 {offsets = [0, 0], sizes = [1, 34], strides = [1, 1]} : vector<8x34xf32> to vector<1x34xf32>
    %27 = vector.extract_strided_slice %26 {offsets = [0, 0], sizes = [1, 1], strides = [1, 1]} : vector<1x34xf32> to vector<1x1xf32>
    %28 = tpu.reciprocal %27 {approx = true} : vector<1x1xf32> -> vector<1x1xf32>
    %29 = arith.mulf %27, %28 : vector<1x1xf32>
    %cst_18 = arith.constant 2.000000e+00 : f32
    %30 = vector.broadcast %cst_18 : f32 to vector<1x1xf32>
    %31 = arith.subf %30, %29 : vector<1x1xf32>
    %32 = arith.mulf %28, %31 : vector<1x1xf32>
    %33 = vector.broadcast %32 : vector<1x1xf32> to vector<1x34xf32>
    %34 = arith.mulf %26, %33 : vector<1x34xf32>
    %35 = vector.extract_strided_slice %25 {offsets = [0, 0], sizes = [8, 1], strides = [1, 1]} : vector<8x34xf32> to vector<8x1xf32>
    %c0_i32 = arith.constant 0 : i32
    %36 = vector.broadcast %c0_i32 : i32 to vector<8x1xi32>
    %37 = arith.cmpi eq, %22, %36 : vector<8x1xi32>
    %38 = vector.broadcast %35 : vector<8x1xf32> to vector<8x34xf32>
    %39 = vector.broadcast %34 : vector<1x34xf32> to vector<8x34xf32>
    %40 = arith.mulf %38, %39 : vector<8x34xf32>
    %41 = arith.subf %25, %40 : vector<8x34xf32>
    %42 = vector.shape_cast %37 : vector<8x1xi1> to vector<8x1xi1>
    %43 = vector.broadcast %42 : vector<8x1xi1> to vector<8x34xi1>
    %44 = vector.shape_cast %34 : vector<1x34xf32> to vector<1x34xf32>
    %45 = vector.broadcast %44 : vector<1x34xf32> to vector<8x34xf32>
    %46 = arith.select %43, %45, %41 : vector<8x34xi1>, vector<8x34xf32>
    %47 = vector.extract_strided_slice %46 {offsets = [1, 0], sizes = [1, 34], strides = [1, 1]} : vector<8x34xf32> to vector<1x34xf32>
    %48 = vector.extract_strided_slice %47 {offsets = [0, 1], sizes = [1, 1], strides = [1, 1]} : vector<1x34xf32> to vector<1x1xf32>
    %49 = tpu.reciprocal %48 {approx = true} : vector<1x1xf32> -> vector<1x1xf32>
    %50 = arith.mulf %48, %49 : vector<1x1xf32>
    %cst_19 = arith.constant 2.000000e+00 : f32
    %51 = vector.broadcast %cst_19 : f32 to vector<1x1xf32>
    %52 = arith.subf %51, %50 : vector<1x1xf32>
    %53 = arith.mulf %49, %52 : vector<1x1xf32>
    %54 = vector.broadcast %53 : vector<1x1xf32> to vector<1x34xf32>
    %55 = arith.mulf %47, %54 : vector<1x34xf32>
    %56 = vector.extract_strided_slice %46 {offsets = [0, 1], sizes = [8, 1], strides = [1, 1]} : vector<8x34xf32> to vector<8x1xf32>
    %c1_i32 = arith.constant 1 : i32
    %57 = vector.broadcast %c1_i32 : i32 to vector<8x1xi32>
    %58 = arith.cmpi eq, %22, %57 : vector<8x1xi32>
    %59 = vector.broadcast %56 : vector<8x1xf32> to vector<8x34xf32>
    %60 = vector.broadcast %55 : vector<1x34xf32> to vector<8x34xf32>
    %61 = arith.mulf %59, %60 : vector<8x34xf32>
    %62 = arith.subf %46, %61 : vector<8x34xf32>
    %63 = vector.shape_cast %58 : vector<8x1xi1> to vector<8x1xi1>
    %64 = vector.broadcast %63 : vector<8x1xi1> to vector<8x34xi1>
    %65 = vector.shape_cast %55 : vector<1x34xf32> to vector<1x34xf32>
    %66 = vector.broadcast %65 : vector<1x34xf32> to vector<8x34xf32>
    %67 = arith.select %64, %66, %62 : vector<8x34xi1>, vector<8x34xf32>
    %68 = vector.extract_strided_slice %67 {offsets = [2, 0], sizes = [1, 34], strides = [1, 1]} : vector<8x34xf32> to vector<1x34xf32>
    %69 = vector.extract_strided_slice %68 {offsets = [0, 2], sizes = [1, 1], strides = [1, 1]} : vector<1x34xf32> to vector<1x1xf32>
    %70 = tpu.reciprocal %69 {approx = true} : vector<1x1xf32> -> vector<1x1xf32>
    %71 = arith.mulf %69, %70 : vector<1x1xf32>
    %cst_20 = arith.constant 2.000000e+00 : f32
    %72 = vector.broadcast %cst_20 : f32 to vector<1x1xf32>
    %73 = arith.subf %72, %71 : vector<1x1xf32>
    %74 = arith.mulf %70, %73 : vector<1x1xf32>
    %75 = vector.broadcast %74 : vector<1x1xf32> to vector<1x34xf32>
    %76 = arith.mulf %68, %75 : vector<1x34xf32>
    %77 = vector.extract_strided_slice %67 {offsets = [0, 2], sizes = [8, 1], strides = [1, 1]} : vector<8x34xf32> to vector<8x1xf32>
    %c2_i32 = arith.constant 2 : i32
    %78 = vector.broadcast %c2_i32 : i32 to vector<8x1xi32>
    %79 = arith.cmpi eq, %22, %78 : vector<8x1xi32>
    %80 = vector.broadcast %77 : vector<8x1xf32> to vector<8x34xf32>
    %81 = vector.broadcast %76 : vector<1x34xf32> to vector<8x34xf32>
    %82 = arith.mulf %80, %81 : vector<8x34xf32>
    %83 = arith.subf %67, %82 : vector<8x34xf32>
    %84 = vector.shape_cast %79 : vector<8x1xi1> to vector<8x1xi1>
    %85 = vector.broadcast %84 : vector<8x1xi1> to vector<8x34xi1>
    %86 = vector.shape_cast %76 : vector<1x34xf32> to vector<1x34xf32>
    %87 = vector.broadcast %86 : vector<1x34xf32> to vector<8x34xf32>
    %88 = arith.select %85, %87, %83 : vector<8x34xi1>, vector<8x34xf32>
    %89 = vector.extract_strided_slice %88 {offsets = [3, 0], sizes = [1, 34], strides = [1, 1]} : vector<8x34xf32> to vector<1x34xf32>
    %90 = vector.extract_strided_slice %89 {offsets = [0, 3], sizes = [1, 1], strides = [1, 1]} : vector<1x34xf32> to vector<1x1xf32>
    %91 = tpu.reciprocal %90 {approx = true} : vector<1x1xf32> -> vector<1x1xf32>
    %92 = arith.mulf %90, %91 : vector<1x1xf32>
    %cst_21 = arith.constant 2.000000e+00 : f32
    %93 = vector.broadcast %cst_21 : f32 to vector<1x1xf32>
    %94 = arith.subf %93, %92 : vector<1x1xf32>
    %95 = arith.mulf %91, %94 : vector<1x1xf32>
    %96 = vector.broadcast %95 : vector<1x1xf32> to vector<1x34xf32>
    %97 = arith.mulf %89, %96 : vector<1x34xf32>
    %98 = vector.extract_strided_slice %88 {offsets = [0, 3], sizes = [8, 1], strides = [1, 1]} : vector<8x34xf32> to vector<8x1xf32>
    %c3_i32 = arith.constant 3 : i32
    %99 = vector.broadcast %c3_i32 : i32 to vector<8x1xi32>
    %100 = arith.cmpi eq, %22, %99 : vector<8x1xi32>
    %101 = vector.broadcast %98 : vector<8x1xf32> to vector<8x34xf32>
    %102 = vector.broadcast %97 : vector<1x34xf32> to vector<8x34xf32>
    %103 = arith.mulf %101, %102 : vector<8x34xf32>
    %104 = arith.subf %88, %103 : vector<8x34xf32>
    %105 = vector.shape_cast %100 : vector<8x1xi1> to vector<8x1xi1>
    %106 = vector.broadcast %105 : vector<8x1xi1> to vector<8x34xi1>
    %107 = vector.shape_cast %97 : vector<1x34xf32> to vector<1x34xf32>
    %108 = vector.broadcast %107 : vector<1x34xf32> to vector<8x34xf32>
    %109 = arith.select %106, %108, %104 : vector<8x34xi1>, vector<8x34xf32>
    %110 = vector.extract_strided_slice %109 {offsets = [4, 0], sizes = [1, 34], strides = [1, 1]} : vector<8x34xf32> to vector<1x34xf32>
    %111 = vector.extract_strided_slice %110 {offsets = [0, 4], sizes = [1, 1], strides = [1, 1]} : vector<1x34xf32> to vector<1x1xf32>
    %112 = tpu.reciprocal %111 {approx = true} : vector<1x1xf32> -> vector<1x1xf32>
    %113 = arith.mulf %111, %112 : vector<1x1xf32>
    %cst_22 = arith.constant 2.000000e+00 : f32
    %114 = vector.broadcast %cst_22 : f32 to vector<1x1xf32>
    %115 = arith.subf %114, %113 : vector<1x1xf32>
    %116 = arith.mulf %112, %115 : vector<1x1xf32>
    %117 = vector.broadcast %116 : vector<1x1xf32> to vector<1x34xf32>
    %118 = arith.mulf %110, %117 : vector<1x34xf32>
    %119 = vector.extract_strided_slice %109 {offsets = [0, 4], sizes = [8, 1], strides = [1, 1]} : vector<8x34xf32> to vector<8x1xf32>
    %c4_i32 = arith.constant 4 : i32
    %120 = vector.broadcast %c4_i32 : i32 to vector<8x1xi32>
    %121 = arith.cmpi eq, %22, %120 : vector<8x1xi32>
    %122 = vector.broadcast %119 : vector<8x1xf32> to vector<8x34xf32>
    %123 = vector.broadcast %118 : vector<1x34xf32> to vector<8x34xf32>
    %124 = arith.mulf %122, %123 : vector<8x34xf32>
    %125 = arith.subf %109, %124 : vector<8x34xf32>
    %126 = vector.shape_cast %121 : vector<8x1xi1> to vector<8x1xi1>
    %127 = vector.broadcast %126 : vector<8x1xi1> to vector<8x34xi1>
    %128 = vector.shape_cast %118 : vector<1x34xf32> to vector<1x34xf32>
    %129 = vector.broadcast %128 : vector<1x34xf32> to vector<8x34xf32>
    %130 = arith.select %127, %129, %125 : vector<8x34xi1>, vector<8x34xf32>
    %131 = vector.extract_strided_slice %130 {offsets = [5, 0], sizes = [1, 34], strides = [1, 1]} : vector<8x34xf32> to vector<1x34xf32>
    %132 = vector.extract_strided_slice %131 {offsets = [0, 5], sizes = [1, 1], strides = [1, 1]} : vector<1x34xf32> to vector<1x1xf32>
    %133 = tpu.reciprocal %132 {approx = true} : vector<1x1xf32> -> vector<1x1xf32>
    %134 = arith.mulf %132, %133 : vector<1x1xf32>
    %cst_23 = arith.constant 2.000000e+00 : f32
    %135 = vector.broadcast %cst_23 : f32 to vector<1x1xf32>
    %136 = arith.subf %135, %134 : vector<1x1xf32>
    %137 = arith.mulf %133, %136 : vector<1x1xf32>
    %138 = vector.broadcast %137 : vector<1x1xf32> to vector<1x34xf32>
    %139 = arith.mulf %131, %138 : vector<1x34xf32>
    %140 = vector.extract_strided_slice %130 {offsets = [0, 5], sizes = [8, 1], strides = [1, 1]} : vector<8x34xf32> to vector<8x1xf32>
    %c5_i32 = arith.constant 5 : i32
    %141 = vector.broadcast %c5_i32 : i32 to vector<8x1xi32>
    %142 = arith.cmpi eq, %22, %141 : vector<8x1xi32>
    %143 = vector.broadcast %140 : vector<8x1xf32> to vector<8x34xf32>
    %144 = vector.broadcast %139 : vector<1x34xf32> to vector<8x34xf32>
    %145 = arith.mulf %143, %144 : vector<8x34xf32>
    %146 = arith.subf %130, %145 : vector<8x34xf32>
    %147 = vector.shape_cast %142 : vector<8x1xi1> to vector<8x1xi1>
    %148 = vector.broadcast %147 : vector<8x1xi1> to vector<8x34xi1>
    %149 = vector.shape_cast %139 : vector<1x34xf32> to vector<1x34xf32>
    %150 = vector.broadcast %149 : vector<1x34xf32> to vector<8x34xf32>
    %151 = arith.select %148, %150, %146 : vector<8x34xi1>, vector<8x34xf32>
    %152 = vector.extract_strided_slice %151 {offsets = [6, 0], sizes = [1, 34], strides = [1, 1]} : vector<8x34xf32> to vector<1x34xf32>
    %153 = vector.extract_strided_slice %152 {offsets = [0, 6], sizes = [1, 1], strides = [1, 1]} : vector<1x34xf32> to vector<1x1xf32>
    %154 = tpu.reciprocal %153 {approx = true} : vector<1x1xf32> -> vector<1x1xf32>
    %155 = arith.mulf %153, %154 : vector<1x1xf32>
    %cst_24 = arith.constant 2.000000e+00 : f32
    %156 = vector.broadcast %cst_24 : f32 to vector<1x1xf32>
    %157 = arith.subf %156, %155 : vector<1x1xf32>
    %158 = arith.mulf %154, %157 : vector<1x1xf32>
    %159 = vector.broadcast %158 : vector<1x1xf32> to vector<1x34xf32>
    %160 = arith.mulf %152, %159 : vector<1x34xf32>
    %161 = vector.extract_strided_slice %151 {offsets = [0, 6], sizes = [8, 1], strides = [1, 1]} : vector<8x34xf32> to vector<8x1xf32>
    %c6_i32 = arith.constant 6 : i32
    %162 = vector.broadcast %c6_i32 : i32 to vector<8x1xi32>
    %163 = arith.cmpi eq, %22, %162 : vector<8x1xi32>
    %164 = vector.broadcast %161 : vector<8x1xf32> to vector<8x34xf32>
    %165 = vector.broadcast %160 : vector<1x34xf32> to vector<8x34xf32>
    %166 = arith.mulf %164, %165 : vector<8x34xf32>
    %167 = arith.subf %151, %166 : vector<8x34xf32>
    %168 = vector.shape_cast %163 : vector<8x1xi1> to vector<8x1xi1>
    %169 = vector.broadcast %168 : vector<8x1xi1> to vector<8x34xi1>
    %170 = vector.shape_cast %160 : vector<1x34xf32> to vector<1x34xf32>
    %171 = vector.broadcast %170 : vector<1x34xf32> to vector<8x34xf32>
    %172 = arith.select %169, %171, %167 : vector<8x34xi1>, vector<8x34xf32>
    %173 = vector.extract_strided_slice %172 {offsets = [7, 0], sizes = [1, 34], strides = [1, 1]} : vector<8x34xf32> to vector<1x34xf32>
    %174 = vector.extract_strided_slice %173 {offsets = [0, 7], sizes = [1, 1], strides = [1, 1]} : vector<1x34xf32> to vector<1x1xf32>
    %175 = tpu.reciprocal %174 {approx = true} : vector<1x1xf32> -> vector<1x1xf32>
    %176 = arith.mulf %174, %175 : vector<1x1xf32>
    %cst_25 = arith.constant 2.000000e+00 : f32
    %177 = vector.broadcast %cst_25 : f32 to vector<1x1xf32>
    %178 = arith.subf %177, %176 : vector<1x1xf32>
    %179 = arith.mulf %175, %178 : vector<1x1xf32>
    %180 = vector.broadcast %179 : vector<1x1xf32> to vector<1x34xf32>
    %181 = arith.mulf %173, %180 : vector<1x34xf32>
    %182 = vector.extract_strided_slice %172 {offsets = [0, 7], sizes = [8, 1], strides = [1, 1]} : vector<8x34xf32> to vector<8x1xf32>
    %c7_i32 = arith.constant 7 : i32
    %183 = vector.broadcast %c7_i32 : i32 to vector<8x1xi32>
    %184 = arith.cmpi eq, %22, %183 : vector<8x1xi32>
    %185 = vector.broadcast %182 : vector<8x1xf32> to vector<8x34xf32>
    %186 = vector.broadcast %181 : vector<1x34xf32> to vector<8x34xf32>
    %187 = arith.mulf %185, %186 : vector<8x34xf32>
    %188 = arith.subf %172, %187 : vector<8x34xf32>
    %189 = vector.shape_cast %184 : vector<8x1xi1> to vector<8x1xi1>
    %190 = vector.broadcast %189 : vector<8x1xi1> to vector<8x34xi1>
    %191 = vector.shape_cast %181 : vector<1x34xf32> to vector<1x34xf32>
    %192 = vector.broadcast %191 : vector<1x34xf32> to vector<8x34xf32>
    %193 = arith.select %190, %192, %188 : vector<8x34xi1>, vector<8x34xf32>
    %194 = arith.subi %23, %24 : vector<32x8xi32>
    %c0_i32_26 = arith.constant 0 : i32
    %195 = vector.broadcast %c0_i32_26 : i32 to vector<32x8xi32>
    %196 = arith.cmpi eq, %194, %195 : vector<32x8xi32>
    %197 = arith.extui %196 : vector<32x8xi1> to vector<32x8xi32>
    %198 = arith.sitofp %197 : vector<32x8xi32> to vector<32x8xf32>
    %199 = vector.extract_strided_slice %21 {offsets = [0, 0], sizes = [32, 8], strides = [1, 1]} : vector<32x34xf32> to vector<32x8xf32>
    %200 = arith.subf %199, %198 : vector<32x8xf32>
    %cst_27 = arith.constant dense<0.000000e+00> : vector<32x34xf32>
    %201 = tpu.matmul %200, %193, %cst_27 {dimension_numbers = #tpu.dot_dimension_numbers<[1], [0], [0], [1], [0, 0, 1, 1], [], []>} : vector<32x8xf32>, vector<8x34xf32>, vector<32x34xf32> -> vector<32x34xf32>
    %202 = arith.subf %21, %201 : vector<32x34xf32>
    %203 = vector.extract_strided_slice %202 {offsets = [8, 0], sizes = [8, 34], strides = [1, 1]} : vector<32x34xf32> to vector<8x34xf32>
    %204 = vector.extract_strided_slice %203 {offsets = [0, 0], sizes = [1, 34], strides = [1, 1]} : vector<8x34xf32> to vector<1x34xf32>
    %205 = vector.extract_strided_slice %204 {offsets = [0, 8], sizes = [1, 1], strides = [1, 1]} : vector<1x34xf32> to vector<1x1xf32>
    %206 = tpu.reciprocal %205 {approx = true} : vector<1x1xf32> -> vector<1x1xf32>
    %207 = arith.mulf %205, %206 : vector<1x1xf32>
    %cst_28 = arith.constant 2.000000e+00 : f32
    %208 = vector.broadcast %cst_28 : f32 to vector<1x1xf32>
    %209 = arith.subf %208, %207 : vector<1x1xf32>
    %210 = arith.mulf %206, %209 : vector<1x1xf32>
    %211 = vector.broadcast %210 : vector<1x1xf32> to vector<1x34xf32>
    %212 = arith.mulf %204, %211 : vector<1x34xf32>
    %213 = vector.extract_strided_slice %203 {offsets = [0, 8], sizes = [8, 1], strides = [1, 1]} : vector<8x34xf32> to vector<8x1xf32>
    %c0_i32_29 = arith.constant 0 : i32
    %214 = vector.broadcast %c0_i32_29 : i32 to vector<8x1xi32>
    %215 = arith.cmpi eq, %22, %214 : vector<8x1xi32>
    %216 = vector.broadcast %213 : vector<8x1xf32> to vector<8x34xf32>
    %217 = vector.broadcast %212 : vector<1x34xf32> to vector<8x34xf32>
    %218 = arith.mulf %216, %217 : vector<8x34xf32>
    %219 = arith.subf %203, %218 : vector<8x34xf32>
    %220 = vector.shape_cast %215 : vector<8x1xi1> to vector<8x1xi1>
    %221 = vector.broadcast %220 : vector<8x1xi1> to vector<8x34xi1>
    %222 = vector.shape_cast %212 : vector<1x34xf32> to vector<1x34xf32>
    %223 = vector.broadcast %222 : vector<1x34xf32> to vector<8x34xf32>
    %224 = arith.select %221, %223, %219 : vector<8x34xi1>, vector<8x34xf32>
    %225 = vector.extract_strided_slice %224 {offsets = [1, 0], sizes = [1, 34], strides = [1, 1]} : vector<8x34xf32> to vector<1x34xf32>
    %226 = vector.extract_strided_slice %225 {offsets = [0, 9], sizes = [1, 1], strides = [1, 1]} : vector<1x34xf32> to vector<1x1xf32>
    %227 = tpu.reciprocal %226 {approx = true} : vector<1x1xf32> -> vector<1x1xf32>
    %228 = arith.mulf %226, %227 : vector<1x1xf32>
    %cst_30 = arith.constant 2.000000e+00 : f32
    %229 = vector.broadcast %cst_30 : f32 to vector<1x1xf32>
    %230 = arith.subf %229, %228 : vector<1x1xf32>
    %231 = arith.mulf %227, %230 : vector<1x1xf32>
    %232 = vector.broadcast %231 : vector<1x1xf32> to vector<1x34xf32>
    %233 = arith.mulf %225, %232 : vector<1x34xf32>
    %234 = vector.extract_strided_slice %224 {offsets = [0, 9], sizes = [8, 1], strides = [1, 1]} : vector<8x34xf32> to vector<8x1xf32>
    %c1_i32_31 = arith.constant 1 : i32
    %235 = vector.broadcast %c1_i32_31 : i32 to vector<8x1xi32>
    %236 = arith.cmpi eq, %22, %235 : vector<8x1xi32>
    %237 = vector.broadcast %234 : vector<8x1xf32> to vector<8x34xf32>
    %238 = vector.broadcast %233 : vector<1x34xf32> to vector<8x34xf32>
    %239 = arith.mulf %237, %238 : vector<8x34xf32>
    %240 = arith.subf %224, %239 : vector<8x34xf32>
    %241 = vector.shape_cast %236 : vector<8x1xi1> to vector<8x1xi1>
    %242 = vector.broadcast %241 : vector<8x1xi1> to vector<8x34xi1>
    %243 = vector.shape_cast %233 : vector<1x34xf32> to vector<1x34xf32>
    %244 = vector.broadcast %243 : vector<1x34xf32> to vector<8x34xf32>
    %245 = arith.select %242, %244, %240 : vector<8x34xi1>, vector<8x34xf32>
    %246 = vector.extract_strided_slice %245 {offsets = [2, 0], sizes = [1, 34], strides = [1, 1]} : vector<8x34xf32> to vector<1x34xf32>
    %247 = vector.extract_strided_slice %246 {offsets = [0, 10], sizes = [1, 1], strides = [1, 1]} : vector<1x34xf32> to vector<1x1xf32>
    %248 = tpu.reciprocal %247 {approx = true} : vector<1x1xf32> -> vector<1x1xf32>
    %249 = arith.mulf %247, %248 : vector<1x1xf32>
    %cst_32 = arith.constant 2.000000e+00 : f32
    %250 = vector.broadcast %cst_32 : f32 to vector<1x1xf32>
    %251 = arith.subf %250, %249 : vector<1x1xf32>
    %252 = arith.mulf %248, %251 : vector<1x1xf32>
    %253 = vector.broadcast %252 : vector<1x1xf32> to vector<1x34xf32>
    %254 = arith.mulf %246, %253 : vector<1x34xf32>
    %255 = vector.extract_strided_slice %245 {offsets = [0, 10], sizes = [8, 1], strides = [1, 1]} : vector<8x34xf32> to vector<8x1xf32>
    %c2_i32_33 = arith.constant 2 : i32
    %256 = vector.broadcast %c2_i32_33 : i32 to vector<8x1xi32>
    %257 = arith.cmpi eq, %22, %256 : vector<8x1xi32>
    %258 = vector.broadcast %255 : vector<8x1xf32> to vector<8x34xf32>
    %259 = vector.broadcast %254 : vector<1x34xf32> to vector<8x34xf32>
    %260 = arith.mulf %258, %259 : vector<8x34xf32>
    %261 = arith.subf %245, %260 : vector<8x34xf32>
    %262 = vector.shape_cast %257 : vector<8x1xi1> to vector<8x1xi1>
    %263 = vector.broadcast %262 : vector<8x1xi1> to vector<8x34xi1>
    %264 = vector.shape_cast %254 : vector<1x34xf32> to vector<1x34xf32>
    %265 = vector.broadcast %264 : vector<1x34xf32> to vector<8x34xf32>
    %266 = arith.select %263, %265, %261 : vector<8x34xi1>, vector<8x34xf32>
    %267 = vector.extract_strided_slice %266 {offsets = [3, 0], sizes = [1, 34], strides = [1, 1]} : vector<8x34xf32> to vector<1x34xf32>
    %268 = vector.extract_strided_slice %267 {offsets = [0, 11], sizes = [1, 1], strides = [1, 1]} : vector<1x34xf32> to vector<1x1xf32>
    %269 = tpu.reciprocal %268 {approx = true} : vector<1x1xf32> -> vector<1x1xf32>
    %270 = arith.mulf %268, %269 : vector<1x1xf32>
    %cst_34 = arith.constant 2.000000e+00 : f32
    %271 = vector.broadcast %cst_34 : f32 to vector<1x1xf32>
    %272 = arith.subf %271, %270 : vector<1x1xf32>
    %273 = arith.mulf %269, %272 : vector<1x1xf32>
    %274 = vector.broadcast %273 : vector<1x1xf32> to vector<1x34xf32>
    %275 = arith.mulf %267, %274 : vector<1x34xf32>
    %276 = vector.extract_strided_slice %266 {offsets = [0, 11], sizes = [8, 1], strides = [1, 1]} : vector<8x34xf32> to vector<8x1xf32>
    %c3_i32_35 = arith.constant 3 : i32
    %277 = vector.broadcast %c3_i32_35 : i32 to vector<8x1xi32>
    %278 = arith.cmpi eq, %22, %277 : vector<8x1xi32>
    %279 = vector.broadcast %276 : vector<8x1xf32> to vector<8x34xf32>
    %280 = vector.broadcast %275 : vector<1x34xf32> to vector<8x34xf32>
    %281 = arith.mulf %279, %280 : vector<8x34xf32>
    %282 = arith.subf %266, %281 : vector<8x34xf32>
    %283 = vector.shape_cast %278 : vector<8x1xi1> to vector<8x1xi1>
    %284 = vector.broadcast %283 : vector<8x1xi1> to vector<8x34xi1>
    %285 = vector.shape_cast %275 : vector<1x34xf32> to vector<1x34xf32>
    %286 = vector.broadcast %285 : vector<1x34xf32> to vector<8x34xf32>
    %287 = arith.select %284, %286, %282 : vector<8x34xi1>, vector<8x34xf32>
    %288 = vector.extract_strided_slice %287 {offsets = [4, 0], sizes = [1, 34], strides = [1, 1]} : vector<8x34xf32> to vector<1x34xf32>
    %289 = vector.extract_strided_slice %288 {offsets = [0, 12], sizes = [1, 1], strides = [1, 1]} : vector<1x34xf32> to vector<1x1xf32>
    %290 = tpu.reciprocal %289 {approx = true} : vector<1x1xf32> -> vector<1x1xf32>
    %291 = arith.mulf %289, %290 : vector<1x1xf32>
    %cst_36 = arith.constant 2.000000e+00 : f32
    %292 = vector.broadcast %cst_36 : f32 to vector<1x1xf32>
    %293 = arith.subf %292, %291 : vector<1x1xf32>
    %294 = arith.mulf %290, %293 : vector<1x1xf32>
    %295 = vector.broadcast %294 : vector<1x1xf32> to vector<1x34xf32>
    %296 = arith.mulf %288, %295 : vector<1x34xf32>
    %297 = vector.extract_strided_slice %287 {offsets = [0, 12], sizes = [8, 1], strides = [1, 1]} : vector<8x34xf32> to vector<8x1xf32>
    %c4_i32_37 = arith.constant 4 : i32
    %298 = vector.broadcast %c4_i32_37 : i32 to vector<8x1xi32>
    %299 = arith.cmpi eq, %22, %298 : vector<8x1xi32>
    %300 = vector.broadcast %297 : vector<8x1xf32> to vector<8x34xf32>
    %301 = vector.broadcast %296 : vector<1x34xf32> to vector<8x34xf32>
    %302 = arith.mulf %300, %301 : vector<8x34xf32>
    %303 = arith.subf %287, %302 : vector<8x34xf32>
    %304 = vector.shape_cast %299 : vector<8x1xi1> to vector<8x1xi1>
    %305 = vector.broadcast %304 : vector<8x1xi1> to vector<8x34xi1>
    %306 = vector.shape_cast %296 : vector<1x34xf32> to vector<1x34xf32>
    %307 = vector.broadcast %306 : vector<1x34xf32> to vector<8x34xf32>
    %308 = arith.select %305, %307, %303 : vector<8x34xi1>, vector<8x34xf32>
    %309 = vector.extract_strided_slice %308 {offsets = [5, 0], sizes = [1, 34], strides = [1, 1]} : vector<8x34xf32> to vector<1x34xf32>
    %310 = vector.extract_strided_slice %309 {offsets = [0, 13], sizes = [1, 1], strides = [1, 1]} : vector<1x34xf32> to vector<1x1xf32>
    %311 = tpu.reciprocal %310 {approx = true} : vector<1x1xf32> -> vector<1x1xf32>
    %312 = arith.mulf %310, %311 : vector<1x1xf32>
    %cst_38 = arith.constant 2.000000e+00 : f32
    %313 = vector.broadcast %cst_38 : f32 to vector<1x1xf32>
    %314 = arith.subf %313, %312 : vector<1x1xf32>
    %315 = arith.mulf %311, %314 : vector<1x1xf32>
    %316 = vector.broadcast %315 : vector<1x1xf32> to vector<1x34xf32>
    %317 = arith.mulf %309, %316 : vector<1x34xf32>
    %318 = vector.extract_strided_slice %308 {offsets = [0, 13], sizes = [8, 1], strides = [1, 1]} : vector<8x34xf32> to vector<8x1xf32>
    %c5_i32_39 = arith.constant 5 : i32
    %319 = vector.broadcast %c5_i32_39 : i32 to vector<8x1xi32>
    %320 = arith.cmpi eq, %22, %319 : vector<8x1xi32>
    %321 = vector.broadcast %318 : vector<8x1xf32> to vector<8x34xf32>
    %322 = vector.broadcast %317 : vector<1x34xf32> to vector<8x34xf32>
    %323 = arith.mulf %321, %322 : vector<8x34xf32>
    %324 = arith.subf %308, %323 : vector<8x34xf32>
    %325 = vector.shape_cast %320 : vector<8x1xi1> to vector<8x1xi1>
    %326 = vector.broadcast %325 : vector<8x1xi1> to vector<8x34xi1>
    %327 = vector.shape_cast %317 : vector<1x34xf32> to vector<1x34xf32>
    %328 = vector.broadcast %327 : vector<1x34xf32> to vector<8x34xf32>
    %329 = arith.select %326, %328, %324 : vector<8x34xi1>, vector<8x34xf32>
    %330 = vector.extract_strided_slice %329 {offsets = [6, 0], sizes = [1, 34], strides = [1, 1]} : vector<8x34xf32> to vector<1x34xf32>
    %331 = vector.extract_strided_slice %330 {offsets = [0, 14], sizes = [1, 1], strides = [1, 1]} : vector<1x34xf32> to vector<1x1xf32>
    %332 = tpu.reciprocal %331 {approx = true} : vector<1x1xf32> -> vector<1x1xf32>
    %333 = arith.mulf %331, %332 : vector<1x1xf32>
    %cst_40 = arith.constant 2.000000e+00 : f32
    %334 = vector.broadcast %cst_40 : f32 to vector<1x1xf32>
    %335 = arith.subf %334, %333 : vector<1x1xf32>
    %336 = arith.mulf %332, %335 : vector<1x1xf32>
    %337 = vector.broadcast %336 : vector<1x1xf32> to vector<1x34xf32>
    %338 = arith.mulf %330, %337 : vector<1x34xf32>
    %339 = vector.extract_strided_slice %329 {offsets = [0, 14], sizes = [8, 1], strides = [1, 1]} : vector<8x34xf32> to vector<8x1xf32>
    %c6_i32_41 = arith.constant 6 : i32
    %340 = vector.broadcast %c6_i32_41 : i32 to vector<8x1xi32>
    %341 = arith.cmpi eq, %22, %340 : vector<8x1xi32>
    %342 = vector.broadcast %339 : vector<8x1xf32> to vector<8x34xf32>
    %343 = vector.broadcast %338 : vector<1x34xf32> to vector<8x34xf32>
    %344 = arith.mulf %342, %343 : vector<8x34xf32>
    %345 = arith.subf %329, %344 : vector<8x34xf32>
    %346 = vector.shape_cast %341 : vector<8x1xi1> to vector<8x1xi1>
    %347 = vector.broadcast %346 : vector<8x1xi1> to vector<8x34xi1>
    %348 = vector.shape_cast %338 : vector<1x34xf32> to vector<1x34xf32>
    %349 = vector.broadcast %348 : vector<1x34xf32> to vector<8x34xf32>
    %350 = arith.select %347, %349, %345 : vector<8x34xi1>, vector<8x34xf32>
    %351 = vector.extract_strided_slice %350 {offsets = [7, 0], sizes = [1, 34], strides = [1, 1]} : vector<8x34xf32> to vector<1x34xf32>
    %352 = vector.extract_strided_slice %351 {offsets = [0, 15], sizes = [1, 1], strides = [1, 1]} : vector<1x34xf32> to vector<1x1xf32>
    %353 = tpu.reciprocal %352 {approx = true} : vector<1x1xf32> -> vector<1x1xf32>
    %354 = arith.mulf %352, %353 : vector<1x1xf32>
    %cst_42 = arith.constant 2.000000e+00 : f32
    %355 = vector.broadcast %cst_42 : f32 to vector<1x1xf32>
    %356 = arith.subf %355, %354 : vector<1x1xf32>
    %357 = arith.mulf %353, %356 : vector<1x1xf32>
    %358 = vector.broadcast %357 : vector<1x1xf32> to vector<1x34xf32>
    %359 = arith.mulf %351, %358 : vector<1x34xf32>
    %360 = vector.extract_strided_slice %350 {offsets = [0, 15], sizes = [8, 1], strides = [1, 1]} : vector<8x34xf32> to vector<8x1xf32>
    %c7_i32_43 = arith.constant 7 : i32
    %361 = vector.broadcast %c7_i32_43 : i32 to vector<8x1xi32>
    %362 = arith.cmpi eq, %22, %361 : vector<8x1xi32>
    %363 = vector.broadcast %360 : vector<8x1xf32> to vector<8x34xf32>
    %364 = vector.broadcast %359 : vector<1x34xf32> to vector<8x34xf32>
    %365 = arith.mulf %363, %364 : vector<8x34xf32>
    %366 = arith.subf %350, %365 : vector<8x34xf32>
    %367 = vector.shape_cast %362 : vector<8x1xi1> to vector<8x1xi1>
    %368 = vector.broadcast %367 : vector<8x1xi1> to vector<8x34xi1>
    %369 = vector.shape_cast %359 : vector<1x34xf32> to vector<1x34xf32>
    %370 = vector.broadcast %369 : vector<1x34xf32> to vector<8x34xf32>
    %371 = arith.select %368, %370, %366 : vector<8x34xi1>, vector<8x34xf32>
    %372 = arith.subi %23, %24 : vector<32x8xi32>
    %c8_i32 = arith.constant 8 : i32
    %373 = vector.broadcast %c8_i32 : i32 to vector<32x8xi32>
    %374 = arith.cmpi eq, %372, %373 : vector<32x8xi32>
    %375 = arith.extui %374 : vector<32x8xi1> to vector<32x8xi32>
    %376 = arith.sitofp %375 : vector<32x8xi32> to vector<32x8xf32>
    %377 = vector.extract_strided_slice %202 {offsets = [0, 8], sizes = [32, 8], strides = [1, 1]} : vector<32x34xf32> to vector<32x8xf32>
    %378 = arith.subf %377, %376 : vector<32x8xf32>
    %cst_44 = arith.constant dense<0.000000e+00> : vector<32x34xf32>
    %379 = tpu.matmul %378, %371, %cst_44 {dimension_numbers = #tpu.dot_dimension_numbers<[1], [0], [0], [1], [0, 0, 1, 1], [], []>} : vector<32x8xf32>, vector<8x34xf32>, vector<32x34xf32> -> vector<32x34xf32>
    %380 = arith.subf %202, %379 : vector<32x34xf32>
    %381 = vector.extract_strided_slice %380 {offsets = [16, 0], sizes = [8, 34], strides = [1, 1]} : vector<32x34xf32> to vector<8x34xf32>
    %382 = vector.extract_strided_slice %381 {offsets = [0, 0], sizes = [1, 34], strides = [1, 1]} : vector<8x34xf32> to vector<1x34xf32>
    %383 = vector.extract_strided_slice %382 {offsets = [0, 16], sizes = [1, 1], strides = [1, 1]} : vector<1x34xf32> to vector<1x1xf32>
    %384 = tpu.reciprocal %383 {approx = true} : vector<1x1xf32> -> vector<1x1xf32>
    %385 = arith.mulf %383, %384 : vector<1x1xf32>
    %cst_45 = arith.constant 2.000000e+00 : f32
    %386 = vector.broadcast %cst_45 : f32 to vector<1x1xf32>
    %387 = arith.subf %386, %385 : vector<1x1xf32>
    %388 = arith.mulf %384, %387 : vector<1x1xf32>
    %389 = vector.broadcast %388 : vector<1x1xf32> to vector<1x34xf32>
    %390 = arith.mulf %382, %389 : vector<1x34xf32>
    %391 = vector.extract_strided_slice %381 {offsets = [0, 16], sizes = [8, 1], strides = [1, 1]} : vector<8x34xf32> to vector<8x1xf32>
    %c0_i32_46 = arith.constant 0 : i32
    %392 = vector.broadcast %c0_i32_46 : i32 to vector<8x1xi32>
    %393 = arith.cmpi eq, %22, %392 : vector<8x1xi32>
    %394 = vector.broadcast %391 : vector<8x1xf32> to vector<8x34xf32>
    %395 = vector.broadcast %390 : vector<1x34xf32> to vector<8x34xf32>
    %396 = arith.mulf %394, %395 : vector<8x34xf32>
    %397 = arith.subf %381, %396 : vector<8x34xf32>
    %398 = vector.shape_cast %393 : vector<8x1xi1> to vector<8x1xi1>
    %399 = vector.broadcast %398 : vector<8x1xi1> to vector<8x34xi1>
    %400 = vector.shape_cast %390 : vector<1x34xf32> to vector<1x34xf32>
    %401 = vector.broadcast %400 : vector<1x34xf32> to vector<8x34xf32>
    %402 = arith.select %399, %401, %397 : vector<8x34xi1>, vector<8x34xf32>
    %403 = vector.extract_strided_slice %402 {offsets = [1, 0], sizes = [1, 34], strides = [1, 1]} : vector<8x34xf32> to vector<1x34xf32>
    %404 = vector.extract_strided_slice %403 {offsets = [0, 17], sizes = [1, 1], strides = [1, 1]} : vector<1x34xf32> to vector<1x1xf32>
    %405 = tpu.reciprocal %404 {approx = true} : vector<1x1xf32> -> vector<1x1xf32>
    %406 = arith.mulf %404, %405 : vector<1x1xf32>
    %cst_47 = arith.constant 2.000000e+00 : f32
    %407 = vector.broadcast %cst_47 : f32 to vector<1x1xf32>
    %408 = arith.subf %407, %406 : vector<1x1xf32>
    %409 = arith.mulf %405, %408 : vector<1x1xf32>
    %410 = vector.broadcast %409 : vector<1x1xf32> to vector<1x34xf32>
    %411 = arith.mulf %403, %410 : vector<1x34xf32>
    %412 = vector.extract_strided_slice %402 {offsets = [0, 17], sizes = [8, 1], strides = [1, 1]} : vector<8x34xf32> to vector<8x1xf32>
    %c1_i32_48 = arith.constant 1 : i32
    %413 = vector.broadcast %c1_i32_48 : i32 to vector<8x1xi32>
    %414 = arith.cmpi eq, %22, %413 : vector<8x1xi32>
    %415 = vector.broadcast %412 : vector<8x1xf32> to vector<8x34xf32>
    %416 = vector.broadcast %411 : vector<1x34xf32> to vector<8x34xf32>
    %417 = arith.mulf %415, %416 : vector<8x34xf32>
    %418 = arith.subf %402, %417 : vector<8x34xf32>
    %419 = vector.shape_cast %414 : vector<8x1xi1> to vector<8x1xi1>
    %420 = vector.broadcast %419 : vector<8x1xi1> to vector<8x34xi1>
    %421 = vector.shape_cast %411 : vector<1x34xf32> to vector<1x34xf32>
    %422 = vector.broadcast %421 : vector<1x34xf32> to vector<8x34xf32>
    %423 = arith.select %420, %422, %418 : vector<8x34xi1>, vector<8x34xf32>
    %424 = vector.extract_strided_slice %423 {offsets = [2, 0], sizes = [1, 34], strides = [1, 1]} : vector<8x34xf32> to vector<1x34xf32>
    %425 = vector.extract_strided_slice %424 {offsets = [0, 18], sizes = [1, 1], strides = [1, 1]} : vector<1x34xf32> to vector<1x1xf32>
    %426 = tpu.reciprocal %425 {approx = true} : vector<1x1xf32> -> vector<1x1xf32>
    %427 = arith.mulf %425, %426 : vector<1x1xf32>
    %cst_49 = arith.constant 2.000000e+00 : f32
    %428 = vector.broadcast %cst_49 : f32 to vector<1x1xf32>
    %429 = arith.subf %428, %427 : vector<1x1xf32>
    %430 = arith.mulf %426, %429 : vector<1x1xf32>
    %431 = vector.broadcast %430 : vector<1x1xf32> to vector<1x34xf32>
    %432 = arith.mulf %424, %431 : vector<1x34xf32>
    %433 = vector.extract_strided_slice %423 {offsets = [0, 18], sizes = [8, 1], strides = [1, 1]} : vector<8x34xf32> to vector<8x1xf32>
    %c2_i32_50 = arith.constant 2 : i32
    %434 = vector.broadcast %c2_i32_50 : i32 to vector<8x1xi32>
    %435 = arith.cmpi eq, %22, %434 : vector<8x1xi32>
    %436 = vector.broadcast %433 : vector<8x1xf32> to vector<8x34xf32>
    %437 = vector.broadcast %432 : vector<1x34xf32> to vector<8x34xf32>
    %438 = arith.mulf %436, %437 : vector<8x34xf32>
    %439 = arith.subf %423, %438 : vector<8x34xf32>
    %440 = vector.shape_cast %435 : vector<8x1xi1> to vector<8x1xi1>
    %441 = vector.broadcast %440 : vector<8x1xi1> to vector<8x34xi1>
    %442 = vector.shape_cast %432 : vector<1x34xf32> to vector<1x34xf32>
    %443 = vector.broadcast %442 : vector<1x34xf32> to vector<8x34xf32>
    %444 = arith.select %441, %443, %439 : vector<8x34xi1>, vector<8x34xf32>
    %445 = vector.extract_strided_slice %444 {offsets = [3, 0], sizes = [1, 34], strides = [1, 1]} : vector<8x34xf32> to vector<1x34xf32>
    %446 = vector.extract_strided_slice %445 {offsets = [0, 19], sizes = [1, 1], strides = [1, 1]} : vector<1x34xf32> to vector<1x1xf32>
    %447 = tpu.reciprocal %446 {approx = true} : vector<1x1xf32> -> vector<1x1xf32>
    %448 = arith.mulf %446, %447 : vector<1x1xf32>
    %cst_51 = arith.constant 2.000000e+00 : f32
    %449 = vector.broadcast %cst_51 : f32 to vector<1x1xf32>
    %450 = arith.subf %449, %448 : vector<1x1xf32>
    %451 = arith.mulf %447, %450 : vector<1x1xf32>
    %452 = vector.broadcast %451 : vector<1x1xf32> to vector<1x34xf32>
    %453 = arith.mulf %445, %452 : vector<1x34xf32>
    %454 = vector.extract_strided_slice %444 {offsets = [0, 19], sizes = [8, 1], strides = [1, 1]} : vector<8x34xf32> to vector<8x1xf32>
    %c3_i32_52 = arith.constant 3 : i32
    %455 = vector.broadcast %c3_i32_52 : i32 to vector<8x1xi32>
    %456 = arith.cmpi eq, %22, %455 : vector<8x1xi32>
    %457 = vector.broadcast %454 : vector<8x1xf32> to vector<8x34xf32>
    %458 = vector.broadcast %453 : vector<1x34xf32> to vector<8x34xf32>
    %459 = arith.mulf %457, %458 : vector<8x34xf32>
    %460 = arith.subf %444, %459 : vector<8x34xf32>
    %461 = vector.shape_cast %456 : vector<8x1xi1> to vector<8x1xi1>
    %462 = vector.broadcast %461 : vector<8x1xi1> to vector<8x34xi1>
    %463 = vector.shape_cast %453 : vector<1x34xf32> to vector<1x34xf32>
    %464 = vector.broadcast %463 : vector<1x34xf32> to vector<8x34xf32>
    %465 = arith.select %462, %464, %460 : vector<8x34xi1>, vector<8x34xf32>
    %466 = vector.extract_strided_slice %465 {offsets = [4, 0], sizes = [1, 34], strides = [1, 1]} : vector<8x34xf32> to vector<1x34xf32>
    %467 = vector.extract_strided_slice %466 {offsets = [0, 20], sizes = [1, 1], strides = [1, 1]} : vector<1x34xf32> to vector<1x1xf32>
    %468 = tpu.reciprocal %467 {approx = true} : vector<1x1xf32> -> vector<1x1xf32>
    %469 = arith.mulf %467, %468 : vector<1x1xf32>
    %cst_53 = arith.constant 2.000000e+00 : f32
    %470 = vector.broadcast %cst_53 : f32 to vector<1x1xf32>
    %471 = arith.subf %470, %469 : vector<1x1xf32>
    %472 = arith.mulf %468, %471 : vector<1x1xf32>
    %473 = vector.broadcast %472 : vector<1x1xf32> to vector<1x34xf32>
    %474 = arith.mulf %466, %473 : vector<1x34xf32>
    %475 = vector.extract_strided_slice %465 {offsets = [0, 20], sizes = [8, 1], strides = [1, 1]} : vector<8x34xf32> to vector<8x1xf32>
    %c4_i32_54 = arith.constant 4 : i32
    %476 = vector.broadcast %c4_i32_54 : i32 to vector<8x1xi32>
    %477 = arith.cmpi eq, %22, %476 : vector<8x1xi32>
    %478 = vector.broadcast %475 : vector<8x1xf32> to vector<8x34xf32>
    %479 = vector.broadcast %474 : vector<1x34xf32> to vector<8x34xf32>
    %480 = arith.mulf %478, %479 : vector<8x34xf32>
    %481 = arith.subf %465, %480 : vector<8x34xf32>
    %482 = vector.shape_cast %477 : vector<8x1xi1> to vector<8x1xi1>
    %483 = vector.broadcast %482 : vector<8x1xi1> to vector<8x34xi1>
    %484 = vector.shape_cast %474 : vector<1x34xf32> to vector<1x34xf32>
    %485 = vector.broadcast %484 : vector<1x34xf32> to vector<8x34xf32>
    %486 = arith.select %483, %485, %481 : vector<8x34xi1>, vector<8x34xf32>
    %487 = vector.extract_strided_slice %486 {offsets = [5, 0], sizes = [1, 34], strides = [1, 1]} : vector<8x34xf32> to vector<1x34xf32>
    %488 = vector.extract_strided_slice %487 {offsets = [0, 21], sizes = [1, 1], strides = [1, 1]} : vector<1x34xf32> to vector<1x1xf32>
    %489 = tpu.reciprocal %488 {approx = true} : vector<1x1xf32> -> vector<1x1xf32>
    %490 = arith.mulf %488, %489 : vector<1x1xf32>
    %cst_55 = arith.constant 2.000000e+00 : f32
    %491 = vector.broadcast %cst_55 : f32 to vector<1x1xf32>
    %492 = arith.subf %491, %490 : vector<1x1xf32>
    %493 = arith.mulf %489, %492 : vector<1x1xf32>
    %494 = vector.broadcast %493 : vector<1x1xf32> to vector<1x34xf32>
    %495 = arith.mulf %487, %494 : vector<1x34xf32>
    %496 = vector.extract_strided_slice %486 {offsets = [0, 21], sizes = [8, 1], strides = [1, 1]} : vector<8x34xf32> to vector<8x1xf32>
    %c5_i32_56 = arith.constant 5 : i32
    %497 = vector.broadcast %c5_i32_56 : i32 to vector<8x1xi32>
    %498 = arith.cmpi eq, %22, %497 : vector<8x1xi32>
    %499 = vector.broadcast %496 : vector<8x1xf32> to vector<8x34xf32>
    %500 = vector.broadcast %495 : vector<1x34xf32> to vector<8x34xf32>
    %501 = arith.mulf %499, %500 : vector<8x34xf32>
    %502 = arith.subf %486, %501 : vector<8x34xf32>
    %503 = vector.shape_cast %498 : vector<8x1xi1> to vector<8x1xi1>
    %504 = vector.broadcast %503 : vector<8x1xi1> to vector<8x34xi1>
    %505 = vector.shape_cast %495 : vector<1x34xf32> to vector<1x34xf32>
    %506 = vector.broadcast %505 : vector<1x34xf32> to vector<8x34xf32>
    %507 = arith.select %504, %506, %502 : vector<8x34xi1>, vector<8x34xf32>
    %508 = vector.extract_strided_slice %507 {offsets = [6, 0], sizes = [1, 34], strides = [1, 1]} : vector<8x34xf32> to vector<1x34xf32>
    %509 = vector.extract_strided_slice %508 {offsets = [0, 22], sizes = [1, 1], strides = [1, 1]} : vector<1x34xf32> to vector<1x1xf32>
    %510 = tpu.reciprocal %509 {approx = true} : vector<1x1xf32> -> vector<1x1xf32>
    %511 = arith.mulf %509, %510 : vector<1x1xf32>
    %cst_57 = arith.constant 2.000000e+00 : f32
    %512 = vector.broadcast %cst_57 : f32 to vector<1x1xf32>
    %513 = arith.subf %512, %511 : vector<1x1xf32>
    %514 = arith.mulf %510, %513 : vector<1x1xf32>
    %515 = vector.broadcast %514 : vector<1x1xf32> to vector<1x34xf32>
    %516 = arith.mulf %508, %515 : vector<1x34xf32>
    %517 = vector.extract_strided_slice %507 {offsets = [0, 22], sizes = [8, 1], strides = [1, 1]} : vector<8x34xf32> to vector<8x1xf32>
    %c6_i32_58 = arith.constant 6 : i32
    %518 = vector.broadcast %c6_i32_58 : i32 to vector<8x1xi32>
    %519 = arith.cmpi eq, %22, %518 : vector<8x1xi32>
    %520 = vector.broadcast %517 : vector<8x1xf32> to vector<8x34xf32>
    %521 = vector.broadcast %516 : vector<1x34xf32> to vector<8x34xf32>
    %522 = arith.mulf %520, %521 : vector<8x34xf32>
    %523 = arith.subf %507, %522 : vector<8x34xf32>
    %524 = vector.shape_cast %519 : vector<8x1xi1> to vector<8x1xi1>
    %525 = vector.broadcast %524 : vector<8x1xi1> to vector<8x34xi1>
    %526 = vector.shape_cast %516 : vector<1x34xf32> to vector<1x34xf32>
    %527 = vector.broadcast %526 : vector<1x34xf32> to vector<8x34xf32>
    %528 = arith.select %525, %527, %523 : vector<8x34xi1>, vector<8x34xf32>
    %529 = vector.extract_strided_slice %528 {offsets = [7, 0], sizes = [1, 34], strides = [1, 1]} : vector<8x34xf32> to vector<1x34xf32>
    %530 = vector.extract_strided_slice %529 {offsets = [0, 23], sizes = [1, 1], strides = [1, 1]} : vector<1x34xf32> to vector<1x1xf32>
    %531 = tpu.reciprocal %530 {approx = true} : vector<1x1xf32> -> vector<1x1xf32>
    %532 = arith.mulf %530, %531 : vector<1x1xf32>
    %cst_59 = arith.constant 2.000000e+00 : f32
    %533 = vector.broadcast %cst_59 : f32 to vector<1x1xf32>
    %534 = arith.subf %533, %532 : vector<1x1xf32>
    %535 = arith.mulf %531, %534 : vector<1x1xf32>
    %536 = vector.broadcast %535 : vector<1x1xf32> to vector<1x34xf32>
    %537 = arith.mulf %529, %536 : vector<1x34xf32>
    %538 = vector.extract_strided_slice %528 {offsets = [0, 23], sizes = [8, 1], strides = [1, 1]} : vector<8x34xf32> to vector<8x1xf32>
    %c7_i32_60 = arith.constant 7 : i32
    %539 = vector.broadcast %c7_i32_60 : i32 to vector<8x1xi32>
    %540 = arith.cmpi eq, %22, %539 : vector<8x1xi32>
    %541 = vector.broadcast %538 : vector<8x1xf32> to vector<8x34xf32>
    %542 = vector.broadcast %537 : vector<1x34xf32> to vector<8x34xf32>
    %543 = arith.mulf %541, %542 : vector<8x34xf32>
    %544 = arith.subf %528, %543 : vector<8x34xf32>
    %545 = vector.shape_cast %540 : vector<8x1xi1> to vector<8x1xi1>
    %546 = vector.broadcast %545 : vector<8x1xi1> to vector<8x34xi1>
    %547 = vector.shape_cast %537 : vector<1x34xf32> to vector<1x34xf32>
    %548 = vector.broadcast %547 : vector<1x34xf32> to vector<8x34xf32>
    %549 = arith.select %546, %548, %544 : vector<8x34xi1>, vector<8x34xf32>
    %550 = arith.subi %23, %24 : vector<32x8xi32>
    %c16_i32 = arith.constant 16 : i32
    %551 = vector.broadcast %c16_i32 : i32 to vector<32x8xi32>
    %552 = arith.cmpi eq, %550, %551 : vector<32x8xi32>
    %553 = arith.extui %552 : vector<32x8xi1> to vector<32x8xi32>
    %554 = arith.sitofp %553 : vector<32x8xi32> to vector<32x8xf32>
    %555 = vector.extract_strided_slice %380 {offsets = [0, 16], sizes = [32, 8], strides = [1, 1]} : vector<32x34xf32> to vector<32x8xf32>
    %556 = arith.subf %555, %554 : vector<32x8xf32>
    %cst_61 = arith.constant dense<0.000000e+00> : vector<32x34xf32>
    %557 = tpu.matmul %556, %549, %cst_61 {dimension_numbers = #tpu.dot_dimension_numbers<[1], [0], [0], [1], [0, 0, 1, 1], [], []>} : vector<32x8xf32>, vector<8x34xf32>, vector<32x34xf32> -> vector<32x34xf32>
    %558 = arith.subf %380, %557 : vector<32x34xf32>
    %559 = vector.extract_strided_slice %558 {offsets = [24, 0], sizes = [8, 34], strides = [1, 1]} : vector<32x34xf32> to vector<8x34xf32>
    %560 = vector.extract_strided_slice %559 {offsets = [0, 0], sizes = [1, 34], strides = [1, 1]} : vector<8x34xf32> to vector<1x34xf32>
    %561 = vector.extract_strided_slice %560 {offsets = [0, 24], sizes = [1, 1], strides = [1, 1]} : vector<1x34xf32> to vector<1x1xf32>
    %562 = tpu.reciprocal %561 {approx = true} : vector<1x1xf32> -> vector<1x1xf32>
    %563 = arith.mulf %561, %562 : vector<1x1xf32>
    %cst_62 = arith.constant 2.000000e+00 : f32
    %564 = vector.broadcast %cst_62 : f32 to vector<1x1xf32>
    %565 = arith.subf %564, %563 : vector<1x1xf32>
    %566 = arith.mulf %562, %565 : vector<1x1xf32>
    %567 = vector.broadcast %566 : vector<1x1xf32> to vector<1x34xf32>
    %568 = arith.mulf %560, %567 : vector<1x34xf32>
    %569 = vector.extract_strided_slice %559 {offsets = [0, 24], sizes = [8, 1], strides = [1, 1]} : vector<8x34xf32> to vector<8x1xf32>
    %c0_i32_63 = arith.constant 0 : i32
    %570 = vector.broadcast %c0_i32_63 : i32 to vector<8x1xi32>
    %571 = arith.cmpi eq, %22, %570 : vector<8x1xi32>
    %572 = vector.broadcast %569 : vector<8x1xf32> to vector<8x34xf32>
    %573 = vector.broadcast %568 : vector<1x34xf32> to vector<8x34xf32>
    %574 = arith.mulf %572, %573 : vector<8x34xf32>
    %575 = arith.subf %559, %574 : vector<8x34xf32>
    %576 = vector.shape_cast %571 : vector<8x1xi1> to vector<8x1xi1>
    %577 = vector.broadcast %576 : vector<8x1xi1> to vector<8x34xi1>
    %578 = vector.shape_cast %568 : vector<1x34xf32> to vector<1x34xf32>
    %579 = vector.broadcast %578 : vector<1x34xf32> to vector<8x34xf32>
    %580 = arith.select %577, %579, %575 : vector<8x34xi1>, vector<8x34xf32>
    %581 = vector.extract_strided_slice %580 {offsets = [1, 0], sizes = [1, 34], strides = [1, 1]} : vector<8x34xf32> to vector<1x34xf32>
    %582 = vector.extract_strided_slice %581 {offsets = [0, 25], sizes = [1, 1], strides = [1, 1]} : vector<1x34xf32> to vector<1x1xf32>
    %583 = tpu.reciprocal %582 {approx = true} : vector<1x1xf32> -> vector<1x1xf32>
    %584 = arith.mulf %582, %583 : vector<1x1xf32>
    %cst_64 = arith.constant 2.000000e+00 : f32
    %585 = vector.broadcast %cst_64 : f32 to vector<1x1xf32>
    %586 = arith.subf %585, %584 : vector<1x1xf32>
    %587 = arith.mulf %583, %586 : vector<1x1xf32>
    %588 = vector.broadcast %587 : vector<1x1xf32> to vector<1x34xf32>
    %589 = arith.mulf %581, %588 : vector<1x34xf32>
    %590 = vector.extract_strided_slice %580 {offsets = [0, 25], sizes = [8, 1], strides = [1, 1]} : vector<8x34xf32> to vector<8x1xf32>
    %c1_i32_65 = arith.constant 1 : i32
    %591 = vector.broadcast %c1_i32_65 : i32 to vector<8x1xi32>
    %592 = arith.cmpi eq, %22, %591 : vector<8x1xi32>
    %593 = vector.broadcast %590 : vector<8x1xf32> to vector<8x34xf32>
    %594 = vector.broadcast %589 : vector<1x34xf32> to vector<8x34xf32>
    %595 = arith.mulf %593, %594 : vector<8x34xf32>
    %596 = arith.subf %580, %595 : vector<8x34xf32>
    %597 = vector.shape_cast %592 : vector<8x1xi1> to vector<8x1xi1>
    %598 = vector.broadcast %597 : vector<8x1xi1> to vector<8x34xi1>
    %599 = vector.shape_cast %589 : vector<1x34xf32> to vector<1x34xf32>
    %600 = vector.broadcast %599 : vector<1x34xf32> to vector<8x34xf32>
    %601 = arith.select %598, %600, %596 : vector<8x34xi1>, vector<8x34xf32>
    %602 = vector.extract_strided_slice %601 {offsets = [2, 0], sizes = [1, 34], strides = [1, 1]} : vector<8x34xf32> to vector<1x34xf32>
    %603 = vector.extract_strided_slice %602 {offsets = [0, 26], sizes = [1, 1], strides = [1, 1]} : vector<1x34xf32> to vector<1x1xf32>
    %604 = tpu.reciprocal %603 {approx = true} : vector<1x1xf32> -> vector<1x1xf32>
    %605 = arith.mulf %603, %604 : vector<1x1xf32>
    %cst_66 = arith.constant 2.000000e+00 : f32
    %606 = vector.broadcast %cst_66 : f32 to vector<1x1xf32>
    %607 = arith.subf %606, %605 : vector<1x1xf32>
    %608 = arith.mulf %604, %607 : vector<1x1xf32>
    %609 = vector.broadcast %608 : vector<1x1xf32> to vector<1x34xf32>
    %610 = arith.mulf %602, %609 : vector<1x34xf32>
    %611 = vector.extract_strided_slice %601 {offsets = [0, 26], sizes = [8, 1], strides = [1, 1]} : vector<8x34xf32> to vector<8x1xf32>
    %c2_i32_67 = arith.constant 2 : i32
    %612 = vector.broadcast %c2_i32_67 : i32 to vector<8x1xi32>
    %613 = arith.cmpi eq, %22, %612 : vector<8x1xi32>
    %614 = vector.broadcast %611 : vector<8x1xf32> to vector<8x34xf32>
    %615 = vector.broadcast %610 : vector<1x34xf32> to vector<8x34xf32>
    %616 = arith.mulf %614, %615 : vector<8x34xf32>
    %617 = arith.subf %601, %616 : vector<8x34xf32>
    %618 = vector.shape_cast %613 : vector<8x1xi1> to vector<8x1xi1>
    %619 = vector.broadcast %618 : vector<8x1xi1> to vector<8x34xi1>
    %620 = vector.shape_cast %610 : vector<1x34xf32> to vector<1x34xf32>
    %621 = vector.broadcast %620 : vector<1x34xf32> to vector<8x34xf32>
    %622 = arith.select %619, %621, %617 : vector<8x34xi1>, vector<8x34xf32>
    %623 = vector.extract_strided_slice %622 {offsets = [3, 0], sizes = [1, 34], strides = [1, 1]} : vector<8x34xf32> to vector<1x34xf32>
    %624 = vector.extract_strided_slice %623 {offsets = [0, 27], sizes = [1, 1], strides = [1, 1]} : vector<1x34xf32> to vector<1x1xf32>
    %625 = tpu.reciprocal %624 {approx = true} : vector<1x1xf32> -> vector<1x1xf32>
    %626 = arith.mulf %624, %625 : vector<1x1xf32>
    %cst_68 = arith.constant 2.000000e+00 : f32
    %627 = vector.broadcast %cst_68 : f32 to vector<1x1xf32>
    %628 = arith.subf %627, %626 : vector<1x1xf32>
    %629 = arith.mulf %625, %628 : vector<1x1xf32>
    %630 = vector.broadcast %629 : vector<1x1xf32> to vector<1x34xf32>
    %631 = arith.mulf %623, %630 : vector<1x34xf32>
    %632 = vector.extract_strided_slice %622 {offsets = [0, 27], sizes = [8, 1], strides = [1, 1]} : vector<8x34xf32> to vector<8x1xf32>
    %c3_i32_69 = arith.constant 3 : i32
    %633 = vector.broadcast %c3_i32_69 : i32 to vector<8x1xi32>
    %634 = arith.cmpi eq, %22, %633 : vector<8x1xi32>
    %635 = vector.broadcast %632 : vector<8x1xf32> to vector<8x34xf32>
    %636 = vector.broadcast %631 : vector<1x34xf32> to vector<8x34xf32>
    %637 = arith.mulf %635, %636 : vector<8x34xf32>
    %638 = arith.subf %622, %637 : vector<8x34xf32>
    %639 = vector.shape_cast %634 : vector<8x1xi1> to vector<8x1xi1>
    %640 = vector.broadcast %639 : vector<8x1xi1> to vector<8x34xi1>
    %641 = vector.shape_cast %631 : vector<1x34xf32> to vector<1x34xf32>
    %642 = vector.broadcast %641 : vector<1x34xf32> to vector<8x34xf32>
    %643 = arith.select %640, %642, %638 : vector<8x34xi1>, vector<8x34xf32>
    %644 = vector.extract_strided_slice %643 {offsets = [4, 0], sizes = [1, 34], strides = [1, 1]} : vector<8x34xf32> to vector<1x34xf32>
    %645 = vector.extract_strided_slice %644 {offsets = [0, 28], sizes = [1, 1], strides = [1, 1]} : vector<1x34xf32> to vector<1x1xf32>
    %646 = tpu.reciprocal %645 {approx = true} : vector<1x1xf32> -> vector<1x1xf32>
    %647 = arith.mulf %645, %646 : vector<1x1xf32>
    %cst_70 = arith.constant 2.000000e+00 : f32
    %648 = vector.broadcast %cst_70 : f32 to vector<1x1xf32>
    %649 = arith.subf %648, %647 : vector<1x1xf32>
    %650 = arith.mulf %646, %649 : vector<1x1xf32>
    %651 = vector.broadcast %650 : vector<1x1xf32> to vector<1x34xf32>
    %652 = arith.mulf %644, %651 : vector<1x34xf32>
    %653 = vector.extract_strided_slice %643 {offsets = [0, 28], sizes = [8, 1], strides = [1, 1]} : vector<8x34xf32> to vector<8x1xf32>
    %c4_i32_71 = arith.constant 4 : i32
    %654 = vector.broadcast %c4_i32_71 : i32 to vector<8x1xi32>
    %655 = arith.cmpi eq, %22, %654 : vector<8x1xi32>
    %656 = vector.broadcast %653 : vector<8x1xf32> to vector<8x34xf32>
    %657 = vector.broadcast %652 : vector<1x34xf32> to vector<8x34xf32>
    %658 = arith.mulf %656, %657 : vector<8x34xf32>
    %659 = arith.subf %643, %658 : vector<8x34xf32>
    %660 = vector.shape_cast %655 : vector<8x1xi1> to vector<8x1xi1>
    %661 = vector.broadcast %660 : vector<8x1xi1> to vector<8x34xi1>
    %662 = vector.shape_cast %652 : vector<1x34xf32> to vector<1x34xf32>
    %663 = vector.broadcast %662 : vector<1x34xf32> to vector<8x34xf32>
    %664 = arith.select %661, %663, %659 : vector<8x34xi1>, vector<8x34xf32>
    %665 = vector.extract_strided_slice %664 {offsets = [5, 0], sizes = [1, 34], strides = [1, 1]} : vector<8x34xf32> to vector<1x34xf32>
    %666 = vector.extract_strided_slice %665 {offsets = [0, 29], sizes = [1, 1], strides = [1, 1]} : vector<1x34xf32> to vector<1x1xf32>
    %667 = tpu.reciprocal %666 {approx = true} : vector<1x1xf32> -> vector<1x1xf32>
    %668 = arith.mulf %666, %667 : vector<1x1xf32>
    %cst_72 = arith.constant 2.000000e+00 : f32
    %669 = vector.broadcast %cst_72 : f32 to vector<1x1xf32>
    %670 = arith.subf %669, %668 : vector<1x1xf32>
    %671 = arith.mulf %667, %670 : vector<1x1xf32>
    %672 = vector.broadcast %671 : vector<1x1xf32> to vector<1x34xf32>
    %673 = arith.mulf %665, %672 : vector<1x34xf32>
    %674 = vector.extract_strided_slice %664 {offsets = [0, 29], sizes = [8, 1], strides = [1, 1]} : vector<8x34xf32> to vector<8x1xf32>
    %c5_i32_73 = arith.constant 5 : i32
    %675 = vector.broadcast %c5_i32_73 : i32 to vector<8x1xi32>
    %676 = arith.cmpi eq, %22, %675 : vector<8x1xi32>
    %677 = vector.broadcast %674 : vector<8x1xf32> to vector<8x34xf32>
    %678 = vector.broadcast %673 : vector<1x34xf32> to vector<8x34xf32>
    %679 = arith.mulf %677, %678 : vector<8x34xf32>
    %680 = arith.subf %664, %679 : vector<8x34xf32>
    %681 = vector.shape_cast %676 : vector<8x1xi1> to vector<8x1xi1>
    %682 = vector.broadcast %681 : vector<8x1xi1> to vector<8x34xi1>
    %683 = vector.shape_cast %673 : vector<1x34xf32> to vector<1x34xf32>
    %684 = vector.broadcast %683 : vector<1x34xf32> to vector<8x34xf32>
    %685 = arith.select %682, %684, %680 : vector<8x34xi1>, vector<8x34xf32>
    %686 = vector.extract_strided_slice %685 {offsets = [6, 0], sizes = [1, 34], strides = [1, 1]} : vector<8x34xf32> to vector<1x34xf32>
    %687 = vector.extract_strided_slice %686 {offsets = [0, 30], sizes = [1, 1], strides = [1, 1]} : vector<1x34xf32> to vector<1x1xf32>
    %688 = tpu.reciprocal %687 {approx = true} : vector<1x1xf32> -> vector<1x1xf32>
    %689 = arith.mulf %687, %688 : vector<1x1xf32>
    %cst_74 = arith.constant 2.000000e+00 : f32
    %690 = vector.broadcast %cst_74 : f32 to vector<1x1xf32>
    %691 = arith.subf %690, %689 : vector<1x1xf32>
    %692 = arith.mulf %688, %691 : vector<1x1xf32>
    %693 = vector.broadcast %692 : vector<1x1xf32> to vector<1x34xf32>
    %694 = arith.mulf %686, %693 : vector<1x34xf32>
    %695 = vector.extract_strided_slice %685 {offsets = [0, 30], sizes = [8, 1], strides = [1, 1]} : vector<8x34xf32> to vector<8x1xf32>
    %c6_i32_75 = arith.constant 6 : i32
    %696 = vector.broadcast %c6_i32_75 : i32 to vector<8x1xi32>
    %697 = arith.cmpi eq, %22, %696 : vector<8x1xi32>
    %698 = vector.broadcast %695 : vector<8x1xf32> to vector<8x34xf32>
    %699 = vector.broadcast %694 : vector<1x34xf32> to vector<8x34xf32>
    %700 = arith.mulf %698, %699 : vector<8x34xf32>
    %701 = arith.subf %685, %700 : vector<8x34xf32>
    %702 = vector.shape_cast %697 : vector<8x1xi1> to vector<8x1xi1>
    %703 = vector.broadcast %702 : vector<8x1xi1> to vector<8x34xi1>
    %704 = vector.shape_cast %694 : vector<1x34xf32> to vector<1x34xf32>
    %705 = vector.broadcast %704 : vector<1x34xf32> to vector<8x34xf32>
    %706 = arith.select %703, %705, %701 : vector<8x34xi1>, vector<8x34xf32>
    %707 = vector.extract_strided_slice %706 {offsets = [7, 0], sizes = [1, 34], strides = [1, 1]} : vector<8x34xf32> to vector<1x34xf32>
    %708 = vector.extract_strided_slice %707 {offsets = [0, 31], sizes = [1, 1], strides = [1, 1]} : vector<1x34xf32> to vector<1x1xf32>
    %709 = tpu.reciprocal %708 {approx = true} : vector<1x1xf32> -> vector<1x1xf32>
    %710 = arith.mulf %708, %709 : vector<1x1xf32>
    %cst_76 = arith.constant 2.000000e+00 : f32
    %711 = vector.broadcast %cst_76 : f32 to vector<1x1xf32>
    %712 = arith.subf %711, %710 : vector<1x1xf32>
    %713 = arith.mulf %709, %712 : vector<1x1xf32>
    %714 = vector.broadcast %713 : vector<1x1xf32> to vector<1x34xf32>
    %715 = arith.mulf %707, %714 : vector<1x34xf32>
    %716 = vector.extract_strided_slice %706 {offsets = [0, 31], sizes = [8, 1], strides = [1, 1]} : vector<8x34xf32> to vector<8x1xf32>
    %c7_i32_77 = arith.constant 7 : i32
    %717 = vector.broadcast %c7_i32_77 : i32 to vector<8x1xi32>
    %718 = arith.cmpi eq, %22, %717 : vector<8x1xi32>
    %719 = vector.broadcast %716 : vector<8x1xf32> to vector<8x34xf32>
    %720 = vector.broadcast %715 : vector<1x34xf32> to vector<8x34xf32>
    %721 = arith.mulf %719, %720 : vector<8x34xf32>
    %722 = arith.subf %706, %721 : vector<8x34xf32>
    %723 = vector.shape_cast %718 : vector<8x1xi1> to vector<8x1xi1>
    %724 = vector.broadcast %723 : vector<8x1xi1> to vector<8x34xi1>
    %725 = vector.shape_cast %715 : vector<1x34xf32> to vector<1x34xf32>
    %726 = vector.broadcast %725 : vector<1x34xf32> to vector<8x34xf32>
    %727 = arith.select %724, %726, %722 : vector<8x34xi1>, vector<8x34xf32>
    %728 = arith.subi %23, %24 : vector<32x8xi32>
    %c24_i32 = arith.constant 24 : i32
    %729 = vector.broadcast %c24_i32 : i32 to vector<32x8xi32>
    %730 = arith.cmpi eq, %728, %729 : vector<32x8xi32>
    %731 = arith.extui %730 : vector<32x8xi1> to vector<32x8xi32>
    %732 = arith.sitofp %731 : vector<32x8xi32> to vector<32x8xf32>
    %733 = vector.extract_strided_slice %558 {offsets = [0, 24], sizes = [32, 8], strides = [1, 1]} : vector<32x34xf32> to vector<32x8xf32>
    %734 = arith.subf %733, %732 : vector<32x8xf32>
    %cst_78 = arith.constant dense<0.000000e+00> : vector<32x34xf32>
    %735 = tpu.matmul %734, %727, %cst_78 {dimension_numbers = #tpu.dot_dimension_numbers<[1], [0], [0], [1], [0, 0, 1, 1], [], []>} : vector<32x8xf32>, vector<8x34xf32>, vector<32x34xf32> -> vector<32x34xf32>
    %736 = arith.subf %558, %735 : vector<32x34xf32>
    %737 = vector.extract_strided_slice %736 {offsets = [0, 32], sizes = [32, 2], strides = [1, 1]} : vector<32x34xf32> to vector<32x2xf32>
    %738 = tpu.iota {dimensions = array<i32: 0>} : vector<2x2xi32>
    %739 = tpu.iota {dimensions = array<i32: 1>} : vector<2x2xi32>
    %740 = arith.cmpi eq, %738, %739 : vector<2x2xi32>
    %741 = arith.extui %740 : vector<2x2xi1> to vector<2x2xi32>
    %742 = arith.sitofp %741 : vector<2x2xi32> to vector<2x2xf32>
    %cst_79 = arith.constant dense<0.000000e+00> : vector<2x32xf32>
    %743 = tpu.matmul %742, %737, %cst_79 {dimension_numbers = #tpu.dot_dimension_numbers<[1], [1], [0], [0], [0, 0, 1, 0], [], []>} : vector<2x2xf32>, vector<32x2xf32>, vector<2x32xf32> -> vector<2x32xf32>
    %c0_80 = arith.constant 0 : index
    %c0_81 = arith.constant 0 : index
    %744 = vector.load %arg5[%c0_80, %c0_81] : memref<2x32xf32, #tpu.memory_space<vmem>>, vector<2x32xf32>
    tpu.vector_store %arg5[%c0_80, %c0_81], %743 {strides = array<i32>} : memref<2x32xf32, #tpu.memory_space<vmem>>, vector<2x32xf32>,
    return
  }
  func.func @transform_0(%arg0: i32) -> (i32, i32) {
    %c0_i32 = arith.constant 0 : i32
    %c0_i32_0 = arith.constant 0 : i32
    %c0_i32_1 = arith.constant 0 : i32
    return %c0_i32, %c0_i32_0 : i32, i32
  }
  func.func @transform_1(%arg0: i32) -> (i32, i32) {
    %c0_i32 = arith.constant 0 : i32
    %c0_i32_0 = arith.constant 0 : i32
    %c0_i32_1 = arith.constant 0 : i32
    return %c0_i32, %c0_i32_0 : i32, i32
  }
  func.func @transform_2(%arg0: i32) -> (i32, i32) {
    %c0_i32 = arith.constant 0 : i32
    %c0_i32_0 = arith.constant 0 : i32
    %c0_i32_1 = arith.constant 0 : i32
    return %c0_i32, %c0_i32_0 : i32, i32
  }
  func.func @transform_3(%arg0: i32) -> (i32, i32) {
    %c0_i32 = arith.constant 0 : i32
    %c0_i32_0 = arith.constant 0 : i32
    %c0_i32_1 = arith.constant 0 : i32
    return %c0_i32, %c0_i32_0 : i32, i32
  }
  func.func @transform_4(%arg0: i32) -> (i32, i32) {
    %c0_i32 = arith.constant 0 : i32
    %c0_i32_0 = arith.constant 0 : i32
    %c0_i32_1 = arith.constant 0 : i32
    return %c0_i32, %c0_i32_0 : i32, i32
  }
  func.func @transform_5(%arg0: i32) -> (i32, i32) {
    %c0_i32 = arith.constant 0 : i32
    %c0_i32_0 = arith.constant 0 : i32
    %c0_i32_1 = arith.constant 0 : i32
    return %c0_i32, %c0_i32_0 : i32, i32
  }
}

</mosaic_0001>

<bundles_post_ra>
// kernel: tpu_custom_call.1
= control target key start
LH: loop header
LB: loop body
LE: loop exit
PB: predicated region body
PF: predicated region fallthrough
CT: control target
= control target key end

     0   :  { %11 = vsyncpa [#allocation4], 0  ;;  %vm35_vm0 = vcmask 261120   ;;  %v2410_v3 = vmov 0.0|0.0   ;;  %vm2411_vm2 = vmmov 0   ;;  %v2412_v7 = vmov 0.0   ;;  %s2893_s0 = inlined_call_operand.vmem [shape: f32[2,32], index: 0, kind: input, shape index: {}]   ;;  %s2894_s1 = inlined_call_operand.vmem [shape: f32[48,32], index: 1, kind: input, shape index: {}]   ;;  %s2895_s2 = inlined_call_operand.vmem [shape: f32[1,48], index: 2, kind: input, shape index: {}]   ;;  %s2896_s3 = inlined_call_operand.vmem [shape: f32[48,48], index: 3, kind: input, shape index: {}]   ;;  %s2897_s4 = inlined_call_operand.hbm [shape: f32[2,32], index: 4, kind: output, shape index: {0}]   ;;  %s2898_s5 = inlined_call_operand.hbm [shape: f32[2,48], index: 5, kind: output, shape index: {1}]  }
   0x1   :  { %v22_v0 = vld [vmem:[%s2894_s1] sm:$0xff]  ;;  %v23_v1 = vld [vmem:[%s2894_s1 + $0x8] sm:$0xff]  ;;  %2115 = vmatprep.subr.bf16.mxu0 %v2410_v3  ;;  %vm2494_vm1 = vmpackc.low %vm35_vm0, %vm35_vm0  ;;  %2025 = vmatprep.mubr.msk.f32.mxu0 %vm2411_vm2, %v2412_v7 }
   0x2   :  { %136 = vxpose.xlu0.b32.start [1/6] (short) (narrow) %v22_v0, 32  ;;  %v2116_v2 = vpack.c.bf16 %v23_v1, %v22_v0  ;;  %v29_v5 = vld [vmem:[%s2896_s3] sm:$0xff]  ;;  %v30_v6 = vld [vmem:[%s2896_s3 + $0x8] sm:$0xff]  ;;  %v31_v9 = vld [vmem:[%s2896_s3 + $0x10] sm:$0xff] }
   0x3   :  { %v2127_v8 = vpack.c.bf16 %v30_v6, %v29_v5  ;;  %v32_v10 = vld [vmem:[%s2896_s3 + $0x18] sm:$0xff]  ;;  %v33_v12 = vld [vmem:[%s2896_s3 + $0x20] sm:$0xff]  ;;  %v34_v13 = vld [vmem:[%s2896_s3 + $0x28] sm:$0xff] }
   0x4   :  { %2118 = vmatpush3.bf16.xpose.msk.msra.mxu0 %vm2494_vm1, %v2116_v2  ;;  %v2131_v11 = vpack.c.bf16 %v32_v10, %v31_v9 }
   0x5   :  { %2119 = vmatprep.subr.bf16.mxu0 %v2410_v3 }
   0x6   :  { %12 = vsyncpa [#allocation6], 0  ;;  %137 = vxpose.xlu0.b32.cont [2/6] (short) (narrow) %v23_v1, 32  ;;  %2128 = vmatprep.subr.bf16.mxu1 %v2127_v8  ;;  %v24_v14 = vld [vmem:[%s2894_s1 + $0x10] sm:$0xff]  ;;  %v25_v15 = vld [vmem:[%s2894_s1 + $0x18] sm:$0xff]  ;;  %v2135_v17 = vpack.c.bf16 %v34_v13, %v33_v12  ;;  %vm168_vm3 = vcmask 392192   ;;  %v266_v34 = vlaneseq }
   0x7   :  { %2130 = vmatpush3.bf16.msra.mxu1 %v2127_v8  ;;  %v2120_v16 = vpack.c.bf16 %v25_v15, %v24_v14  ;;  %v26_v18 = vld [vmem:[%s2894_s1 + $0x20] sm:$0xff]  ;;  %v27_v19 = vld [vmem:[%s2894_s1 + $0x28] sm:$0xff]  ;;  %vm134_vm4 = vcmask 386048   ;;  %v2413_v44 = vmov 0   ;;  %vm494_vm7 = vcmask 277760   ;;  %s2429_s18 = smov 8  }
   0x8   :  { %2132 = vmatprep.subr.bf16.mxu1 %v2131_v11  ;;  %v2124_v20 = vpack.c.bf16 %v27_v19, %v26_v18  ;;  %v21_v21 = vld [vmem:[%s2893_s0] sm:$0x3]  ;;  %v2559_v35 = vshrl.u32 %v266_v34, 7  ;;  %v2564_v37 = vand.u32 127, %v266_v34  ;;  %2206 = vset.pattern.permute.xlu1 %v2413_v44  ;;  %vm723_vm9 = vcmask 64512   ;;  %s2431_s19 = smov 120  }
   0x9   :  { %v1907_v26 = vld [vmem:[%s2895_s2] ss:$0 sm:$0xff]  ;;  %s2414_s2 = smov 32   ;;  %v2415_v58 = vmov 1   ;;  %v2417_v34 = vmov 3   ;;  %s2439_s20 = smov 16  }
   0xa   :  { %138 = vxpose.xlu0.b32.cont [3/6] (short) (narrow) %v24_v14, 32  ;;  %v2562_v36 = vadd.s32 8, %v2559_v35  ;;  %vm273_vm6 = vcmp.eq.s32.totalorder %v2559_v35, %v2564_v37  ;;  %v703_v49 = vsub.s32 %v2559_v35, %v2564_v37  ;;  %v2592_v59 = vadd.s32 24, %v2559_v35  ;;  %s2441_s21 = smov 112   ;;  %s2449_s22 = smov 24  }
   0xb   :  { %2134 = vmatpush3.bf16.msra.mxu1 %v2131_v11  ;;  %v2572_v39 = vsel %vm273_vm6, 1.0, %v2412_v7  ;;  %v2597_v62 = vadd.s32 16, %v2559_v35  ;;  %v2610_v9 = vsub.s32 0, %v2559_v35  ;;  %vm513_vm12 = vcmp.eq.s32.totalorder %v2559_v35, 0  ;;  %s2451_s23 = smov 104   ;;  %s2452_s24 = smov 96  }
   0xc   :  { %2122 = vmatpush3.bf16.xpose.msk.msra.mxu0 %vm2494_vm1, %v2120_v16  ;;  %2136 = vmatprep.subr.bf16.mxu1 %v2135_v17  ;;  %vm274_vm5 = vcmp.eq.s32.totalorder %v2562_v36, %v2564_v37  ;;  %v285_v41 = vmul.f32 0.1, %v2572_v39  ;;  %vm707_vm8 = vcmp.eq.s32.totalorder %v703_v49, 0  ;;  %vm276_vm10 = vcmp.eq.s32.totalorder %v2592_v59, %v2564_v37  ;;  %s2453_s25 = smov [#allocation5]  }
   0xd   :  { %2123 = vmatprep.subr.bf16.mxu0 %v2410_v3  ;;  %v1913_v38 = vsel %vm274_vm5, 1.0, %v2412_v7  ;;  %v1925_v51 = vsel %vm707_vm8, 1.0, %v2412_v7  ;;  %vm275_vm11 = vcmp.eq.s32.totalorder %v2597_v62, %v2564_v37  ;;  %v1915_v1 = vsel %vm276_vm10, 1.0, %v2412_v7  ;;  %s1888_s26 = sshll.u32 %s2453_s25, 4  ;;  %s1889_s26 = int_to_ptr.vmem [resolvable:$true] %s1888_s26 }
   0xe   :  { %139 = vxpose.xlu0.b32.cont [4/6] (short) (narrow) %v25_v15, 32  ;;  %v286_v40 = vmul.f32 0.1, %v1913_v38  ;;  %v288_v4 = vmul.f32 0.1, %v1915_v1  ;;  %vm538_vm13 = vcmp.eq.s32.totalorder %v2559_v35, 1  ;;  %p2367_p1 = scmp.lt.s32.totalorder %s1889_s26, %s1889_s26 }
   0xf   :  { %2138 = vmatpush3.bf16.msra.mxu1 %v2135_v17  ;;  %v2626_v38 = vsub.s32 2, %v2559_v35  ;;  %vm563_vm14 = vcmp.eq.s32.totalorder %v2559_v35, 2  ;;  %vm588_vm15 = vcmp.eq.s32.totalorder %v2559_v35, 3  ;;  %s2362_s27 = scalar_lea.vmem %s1889_s26, 32 }
  0x10   :  { %2140 = vmatprep.subr.bf16.mxu1 %v2116_v2  ;;  %p2363_p0 = scmp.ne.s32.totalorder %s1889_s26, %s2362_s27  ;;  %p2368_p2 = scmp.lt.s32.totalorder %s2362_s27, %s2362_s27 }
  0x12   :  { %140 = vxpose.xlu0.b32.cont [5/6] (short) (narrow) %v26_v18, 32  ;;  %p2369_p3 = por %p2368_p2, %p2367_p1 }
  0x14   :  { %2126 = vmatpush3.bf16.xpose.msk.msra.mxu0 %vm2494_vm1, %v2124_v20  ;;  %vm638_vm1 = vcmp.eq.s32.totalorder %v2559_v35, 5  ;;  %p2370_p4 = pnand %p2369_p3, %p2363_p0 }
  0x16   :  { %141 = vxpose.xlu0.b32.end [6/6] (short) (narrow) %v27_v19, 32 }
  0x1b   :  { %2026 = vmatmul.mubr.msk.f32.vlgmr.msra.gmra.mrb[0].mxu0 %vm35_vm0, %v21_v21  ;;  %v2416_v21 = vmov 2  }
  0x3f   :  { %2209 = vset.pattern.permute.xlu0 %v2416_v21 }
  0x82   :  { %v152_v22 = vpop.trf.xlu0 }
  0x83   :  { %2040 = vmatprep.mubr.msk.f32.mxu1 %vm168_vm3, %v152_v22  ;;  %v2619_v22 = vsub.s32 1, %v2559_v35 }
  0x86   :  { %v153_v23 = vpop.trf.xlu0 }
  0x87   :  { %2041 = vmatmul.mubr.msk.f32.vlgmr.msra.gmra.mrb[0].mxu1 %vm168_vm3, %v153_v23 }
  0x88   :  { %2142 = vmatpush3.bf16.msra.mxu1 %v2116_v2  ;;  %v1914_v2 = vsel %vm275_vm11, 1.0, %v2412_v7 }
  0x89   :  { %2144 = vmatprep.subr.bf16.mxu1 %v2120_v16  ;;  %v287_v5 = vmul.f32 0.1, %v1914_v2 }
  0x8a   :  { %v154_v24 = vpop.trf.xlu0 }
  0x8b   :  { %2043 = vmatprep.mubr.msk.f32.mxu1 %vm168_vm3, %v154_v24 }
  0x8c   :  { %2146 = vmatpush3.bf16.msra.mxu1 %v2120_v16 }
  0x8d   :  { %2148 = vmatprep.subr.bf16.mxu1 %v2124_v20 }
  0x8e   :  { %v155_v25 = vpop.trf.xlu0 }
  0x8f   :  { %2044 = vmatmul.mubr.msk.f32.gmra.mrb[2].mxu1 %vm168_vm3, %v155_v25 }
  0x90   :  { %2150 = vmatpush3.bf16.msra.mxu1 %v2124_v20 }
  0xee   :  { %v123_v27 = vpop.f32.mrb[0].mxu0 }
  0xef   :  { %v133_v28 = vsub.f32 %v123_v27, %v1907_v26  ;;  %v2027_v29 = vpop.f32.mrb[1].mxu0 }
  0xf1   :  { %2064 = vmatprep.subr.msk.mxu0 %vm168_vm3, %v133_v28  ;;  %135 = vst.msk [vmem:[#allocation5] sm:$0x3] %vm134_vm4, %v133_v28  ;;  %vm688_vm4 = vcmp.eq.s32.totalorder %v2559_v35, 7 }
  0xf2   :  { %2065 = vmatpush3.xpose.msk.msra.mxu0 %vm168_vm3, %v133_v28 }
 0x15a   :  { %v2042_v30 = vpop.f32.mrb[0].mxu1 }
 0x15b   :  { %v247_v31 = vpop.f32.mrb[1].mxu1 }
 0x15c   :  { %2058 = vmatprep.mubr.msk.f32.mxu1 %vm168_vm3, %v247_v31  ;;  %2066 = vmatprep.mubr.msk.f32.mxu0 %vm168_vm3, %v247_v31 }
 0x15d   :  { %2059 = vmatmul.mubr.msk.f32.vlgmr.msra.gmra.mrb[4].mxu1 %vm168_vm3, %v2042_v30  ;;  %2067 = vmatmul.mubr.msk.f32.vlgmr.msra.gmra.mrb[2].mxu0 %vm168_vm3, %v2042_v30 }
 0x162   :  { %v2045_v32 = vpop.f32.mrb[2].mxu1 }
 0x163   :  { %v257_v33 = vpop.f32.mrb[3].mxu1 }
 0x164   :  { %2061 = vmatprep.mubr.msk.f32.mxu1 %vm168_vm3, %v257_v33  ;;  %2069 = vmatprep.mubr.msk.f32.mxu0 %vm168_vm3, %v257_v33 }
 0x165   :  { %2062 = vmatmul.mubr.msk.f32.gmra.mrb[6].mxu1 %vm168_vm3, %v2045_v32  ;;  %2070 = vmatmul.mubr.msk.f32.gmra.mrb[4].mxu0 %vm168_vm3, %v2045_v32  ;;  %vm663_vm3 = vcmp.eq.s32.totalorder %v2559_v35, 6 }
 0x230   :  { %v2060_v42 = vpop.f32.mrb[4].mxu1  ;;  %v2575_v43 = vpop.f32.mrb[2].mxu0 }
 0x231   :  { %v373_v45 = vadd.f32 %v2060_v42, %v286_v40  ;;  %v367_v46 = vpop.f32.mrb[5].mxu1  ;;  %v455_v47 = vpop.f32.mrb[3].mxu0 }
 0x232   :  { %v368_v48 = vadd.f32 %v367_v46, %v285_v41  ;;  %482 = vrot.lane.b32.xlu1 %v455_v47, %s2414_s2 }
 0x233   :  { %475 = vst.msk [vmem:[#allocation2 + $0x8] sm:$0xff] %vm35_vm0, %v373_v45 }
 0x234   :  { %474 = vst.msk [vmem:[#allocation2] sm:$0xff] %vm35_vm0, %v368_v48 }
 0x238   :  { %v2063_v60 = vpop.f32.mrb[6].mxu1  ;;  %v2594_v61 = vpop.f32.mrb[4].mxu0 }
 0x239   :  { %v377_v63 = vpop.f32.mrb[7].mxu1  ;;  %v2599_v0 = vpop.f32.mrb[5].mxu0  ;;  %v383_v6 = vadd.f32 %v2063_v60, %v288_v4 }
 0x23a   :  { %v378_v8 = vadd.f32 %v377_v63, %v287_v5 }
 0x23b   :  { %477 = vst.msk [vmem:[#allocation2 + $0x18] sm:$0xff] %vm35_vm0, %v383_v6 }
 0x23c   :  { %476 = vst.msk [vmem:[#allocation2 + $0x10] sm:$0xff] %vm35_vm0, %v378_v8  ;;  %v2419_v8 = vmov 5   ;;  %vm613_vm0 = vcmp.eq.s32.totalorder %v2559_v35, 4 }
 0x2a4   :  { %v483_v50 = vpop.permute.xlu1 %482 }
 0x2a5   :  { %495 = vst.msk [vmem:[#allocation2] sm:$0xff] %vm494_vm7, %v483_v50 }
 0x2ac   :  { %v2584_v52 = vld [vmem:[#allocation2] sm:$0xff] }
 0x2ad   :  { %v719_v53 = vsub.f32 %v2584_v52, %v1925_v51  ;;  %2298 = vrcp.f32 %v2584_v52 }
 0x2af   :  { %2074 = vmatprep.mubr.msk.f32.mxu0 %vm723_vm9, %v719_v53  ;;  %v2418_v53 = vmov 4  }
 0x2b7   :  { %v2299_v54 = vpop.eup %2298 }
 0x2b8   :  { %v504_v55 = vmul.f32 %v2299_v54, %v2584_v52 }
 0x2ba   :  { %v505_v56 = vsub.f32 2.0, %v504_v55 }
 0x2bc   :  { %v506_v57 = vmul.f32 %v2299_v54, %v505_v56  ;;  %v2633_v54 = vsub.s32 3, %v2559_v35 }
 0x2be   :  { %509 = vperm.xlu1 %2206, %v506_v57  }
 0x2c2   :  { %516 = vperm.xlu1 %2206, %v2584_v52  }
 0x2c6   :  { %2207 = vset.pattern.permute.xlu1 %v2415_v58 }
 0x33d   :  { %v510_v10 = vpop.permute.xlu1 %509 }
 0x33e   :  { %v512_v11 = vmul.f32 %v510_v10, %v2584_v52  ;;  %v2640_v10 = vsub.s32 4, %v2559_v35 }
 0x340   :  { %v522_v12 = vrot.slane %v512_v11, %v2610_v9 }
 0x341   :  { %v517_v13 = vpop.permute.xlu1 %516 }
 0x342   :  { %v523_v14 = vmul.f32 %v522_v12, %v517_v13 }
 0x344   :  { %v524_v15 = vsub.f32 %v2584_v52, %v523_v14 }
 0x346   :  { %v527_v16 = vsel %vm513_vm12, %v522_v12, %v524_v15 }
 0x347   :  { %2300 = vrcp.f32 %v527_v16 }
 0x351   :  { %v2301_v17 = vpop.eup %2300 }
 0x352   :  { %v529_v18 = vmul.f32 %v2301_v17, %v527_v16 }
 0x354   :  { %v530_v19 = vsub.f32 2.0, %v529_v18 }
 0x356   :  { %v531_v20 = vmul.f32 %v2301_v17, %v530_v19 }
 0x358   :  { %534 = vperm.xlu1 %2207, %v531_v20  }
 0x35c   :  { %541 = vperm.xlu1 %2207, %v527_v16  }
 0x360   :  { %2208 = vset.pattern.permute.xlu1 %v2416_v21 }
 0x3d7   :  { %v535_v23 = vpop.permute.xlu1 %534 }
 0x3d8   :  { %v537_v24 = vmul.f32 %v535_v23, %v527_v16  ;;  %v2420_v23 = vmov 6  }
 0x3da   :  { %v547_v25 = vrot.slane %v537_v24, %v2619_v22  ;;  %v2647_v24 = vsub.s32 5, %v2559_v35 }
 0x3db   :  { %v542_v26 = vpop.permute.xlu1 %541 }
 0x3dc   :  { %v548_v27 = vmul.f32 %v547_v25, %v542_v26 }
 0x3de   :  { %v549_v28 = vsub.f32 %v527_v16, %v548_v27 }
 0x3e0   :  { %v552_v29 = vsel %vm538_vm13, %v547_v25, %v549_v28 }
 0x3e1   :  { %566 = vperm.xlu0 %2209, %v552_v29   ;;  %2302 = vrcp.f32 %v552_v29 }
 0x3eb   :  { %v2303_v30 = vpop.eup %2302 }
 0x3ec   :  { %v554_v31 = vmul.f32 %v2303_v30, %v552_v29 }
 0x3ee   :  { %v555_v32 = vsub.f32 2.0, %v554_v31 }
 0x3f0   :  { %v556_v33 = vmul.f32 %v2303_v30, %v555_v32 }
 0x3f2   :  { %559 = vperm.xlu1 %2208, %v556_v33  }
 0x3f6   :  { %2210 = vset.pattern.permute.xlu1 %v2417_v34 }
 0x460   :  { %v567_v44 = vpop.permute.xlu0 %566 }
 0x471   :  { %v560_v40 = vpop.permute.xlu1 %559 }
 0x472   :  { %v562_v41 = vmul.f32 %v560_v40, %v552_v29 }
 0x474   :  { %v572_v42 = vrot.slane %v562_v41, %v2626_v38  ;;  %v2421_v41 = vmov 7  }
 0x476   :  { %v573_v45 = vmul.f32 %v572_v42, %v567_v44 }
 0x478   :  { %v574_v46 = vsub.f32 %v552_v29, %v573_v45 }
 0x47a   :  { %v577_v47 = vsel %vm563_vm14, %v572_v42, %v574_v46  ;;  %v2654_v42 = vsub.s32 6, %v2559_v35 }
 0x47b   :  { %2304 = vrcp.f32 %v577_v47 }
 0x485   :  { %v2305_v48 = vpop.eup %2304 }
 0x486   :  { %v579_v49 = vmul.f32 %v2305_v48, %v577_v47 }
 0x488   :  { %v580_v50 = vsub.f32 2.0, %v579_v49 }
 0x48a   :  { %v581_v51 = vmul.f32 %v2305_v48, %v580_v50 }
 0x48c   :  { %584 = vperm.xlu1 %2210, %v581_v51  }
 0x490   :  { %591 = vperm.xlu1 %2210, %v577_v47  }
 0x494   :  { %2211 = vset.pattern.permute.xlu1 %v2418_v53 }
 0x50b   :  { %v585_v55 = vpop.permute.xlu1 %584 }
 0x50c   :  { %v587_v56 = vmul.f32 %v585_v55, %v577_v47 }
 0x50e   :  { %v597_v57 = vrot.slane %v587_v56, %v2633_v54 }
 0x50f   :  { %v592_v58 = vpop.permute.xlu1 %591 }
 0x510   :  { %v598_v60 = vmul.f32 %v597_v57, %v592_v58 }
 0x512   :  { %v599_v63 = vsub.f32 %v577_v47, %v598_v60 }
 0x514   :  { %v602_v1 = vsel %vm588_vm15, %v597_v57, %v599_v63  ;;  %v2663_v57 = vsub.s32 7, %v2559_v35 }
 0x515   :  { %2306 = vrcp.f32 %v602_v1 }
 0x51f   :  { %v2307_v2 = vpop.eup %2306 }
 0x520   :  { %v604_v4 = vmul.f32 %v2307_v2, %v602_v1 }
 0x522   :  { %v605_v5 = vsub.f32 2.0, %v604_v4  ;;  %v2669_v4 = vsub.s32 %v2562_v36, %v2564_v37  ;;  %v2422_v36 = vmov 8  }
 0x523   :  { %2215 = vset.pattern.permute.xlu0 %v2422_v36 }
 0x524   :  { %v606_v6 = vmul.f32 %v2307_v2, %v605_v5  ;;  %vm708_vm5 = vcmp.eq.s32.totalorder %v2669_v4, 0 }
 0x526   :  { %609 = vperm.xlu1 %2211, %v606_v6  }
 0x52a   :  { %616 = vperm.xlu1 %2211, %v602_v1  }
 0x52e   :  { %2212 = vset.pattern.permute.xlu1 %v2419_v8  ;;  %v1926_v8 = vsel %vm708_vm5, 1.0, %v2412_v7 }
 0x5a5   :  { %v610_v11 = vpop.permute.xlu1 %609 }
 0x5a6   :  { %v612_v12 = vmul.f32 %v610_v11, %v602_v1 }
 0x5a8   :  { %v622_v13 = vrot.slane %v612_v12, %v2640_v10 }
 0x5a9   :  { %v617_v14 = vpop.permute.xlu1 %616 }
 0x5aa   :  { %v623_v15 = vmul.f32 %v622_v13, %v617_v14 }
 0x5ac   :  { %v624_v16 = vsub.f32 %v602_v1, %v623_v15 }
 0x5ae   :  { %v627_v17 = vsel %vm613_vm0, %v622_v13, %v624_v16 }
 0x5af   :  { %2308 = vrcp.f32 %v627_v17 }
 0x5b9   :  { %v2309_v18 = vpop.eup %2308 }
 0x5ba   :  { %v629_v19 = vmul.f32 %v2309_v18, %v627_v17 }
 0x5bc   :  { %v630_v20 = vsub.f32 2.0, %v629_v19 }
 0x5be   :  { %v631_v21 = vmul.f32 %v2309_v18, %v630_v20  ;;  %v2423_v20 = vmov 9  }
 0x5c0   :  { %634 = vperm.xlu1 %2212, %v631_v21  }
 0x5c4   :  { %641 = vperm.xlu1 %2212, %v627_v17  }
 0x5c8   :  { %2213 = vset.pattern.permute.xlu1 %v2420_v23 }
 0x63f   :  { %v635_v25 = vpop.permute.xlu1 %634 }
 0x640   :  { %v637_v26 = vmul.f32 %v635_v25, %v627_v17 }
 0x642   :  { %v647_v27 = vrot.slane %v637_v26, %v2647_v24 }
 0x643   :  { %v642_v28 = vpop.permute.xlu1 %641 }
 0x644   :  { %v648_v29 = vmul.f32 %v647_v27, %v642_v28 }
 0x646   :  { %v649_v30 = vsub.f32 %v627_v17, %v648_v29 }
 0x648   :  { %v652_v31 = vsel %vm638_vm1, %v647_v27, %v649_v30 }
 0x649   :  { %2310 = vrcp.f32 %v652_v31 }
 0x653   :  { %v2311_v32 = vpop.eup %2310 }
 0x654   :  { %v654_v33 = vmul.f32 %v2311_v32, %v652_v31 }
 0x656   :  { %v655_v34 = vsub.f32 2.0, %v654_v33 }
 0x658   :  { %v656_v40 = vmul.f32 %v2311_v32, %v655_v34  ;;  %v2424_v34 = vmov 10  }
 0x65a   :  { %659 = vperm.xlu1 %2213, %v656_v40  }
 0x65e   :  { %666 = vperm.xlu1 %2213, %v652_v31  }
 0x662   :  { %2214 = vset.pattern.permute.xlu1 %v2421_v41 }
 0x6d9   :  { %v660_v44 = vpop.permute.xlu1 %659 }
 0x6da   :  { %v662_v45 = vmul.f32 %v660_v44, %v652_v31 }
 0x6dc   :  { %v672_v46 = vrot.slane %v662_v45, %v2654_v42 }
 0x6dd   :  { %v667_v47 = vpop.permute.xlu1 %666 }
 0x6de   :  { %v673_v48 = vmul.f32 %v672_v46, %v667_v47 }
 0x6e0   :  { %v674_v49 = vsub.f32 %v652_v31, %v673_v48 }
 0x6e2   :  { %v677_v50 = vsel %vm663_vm3, %v672_v46, %v674_v49 }
 0x6e3   :  { %2312 = vrcp.f32 %v677_v50 }
 0x6ed   :  { %v2313_v51 = vpop.eup %2312 }
 0x6ee   :  { %v679_v53 = vmul.f32 %v2313_v51, %v677_v50 }
 0x6f0   :  { %v680_v55 = vsub.f32 2.0, %v679_v53 }
 0x6f2   :  { %v681_v56 = vmul.f32 %v2313_v51, %v680_v55  ;;  %v2425_v55 = vmov 11  }
 0x6f4   :  { %684 = vperm.xlu1 %2214, %v681_v56  }
 0x6f8   :  { %691 = vperm.xlu1 %2214, %v677_v50  }
 0x6fc   :  { %484 = vrot.lane.b32.xlu1 %v2575_v43, %s2414_s2 }
 0x6fd   :  { %2216 = vset.pattern.permute.xlu1 %v2422_v36 }
 0x773   :  { %v685_v58 = vpop.permute.xlu1 %684 }
 0x774   :  { %v687_v60 = vmul.f32 %v685_v58, %v677_v50 }
 0x776   :  { %v697_v63 = vrot.slane %v687_v60, %v2663_v57 }
 0x777   :  { %v692_v1 = vpop.permute.xlu1 %691 }
 0x778   :  { %v698_v2 = vmul.f32 %v697_v63, %v692_v1 }
 0x77a   :  { %v699_v5 = vsub.f32 %v677_v50, %v698_v2 }
 0x77b   :  { %v485_v6 = vpop.permute.xlu1 %484 }
 0x77c   :  { %496 = vst.msk [vmem:[#allocation2 + $0x8] sm:$0xff] %vm494_vm7, %v485_v6  ;;  %v702_v43 = vsel %vm688_vm4, %v697_v63, %v699_v5 }
 0x77d   :  { %2072 = vmatprep.subr.mxu0 %v702_v43  ;;  %2159 = vmatprep.subr.mxu1 %v702_v43 }
 0x77e   :  { %2073 = vmatpush3.msra.mxu0 %v702_v43  ;;  %2160 = vmatpush3.msra.mxu1 %v702_v43 }
 0x783   :  { %v500_v11 = vld [vmem:[#allocation2 + $0x8] sm:$0xff] }
 0x784   :  { %v720_v12 = vsub.f32 %v500_v11, %v1926_v8 }
 0x786   :  { %2075 = vmatmul.mubr.msk.f32.vlgmr.msra.gmra.mrb[6].mxu0 %vm723_vm9, %v720_v12  ;;  %v2426_v12 = vmov 12  }
 0x859   :  { %v2076_v13 = vpop.f32.mrb[6].mxu0 }
 0x85a   :  { %v2677_v14 = vsub.f32 %v500_v11, %v2076_v13  ;;  %v2679_v15 = vpop.f32.mrb[7].mxu0 }
 0x85c   :  { %837 = vperm.xlu1 %2216, %v2677_v14   ;;  %2314 = vrcp.f32 %v2677_v14 }
 0x860   :  { %2217 = vset.pattern.permute.xlu1 %v2423_v20 }
 0x866   :  { %v2315_v16 = vpop.eup %2314 }
 0x867   :  { %v826_v17 = vmul.f32 %v2315_v16, %v2677_v14 }
 0x869   :  { %v827_v18 = vsub.f32 2.0, %v826_v17 }
 0x86b   :  { %v828_v19 = vmul.f32 %v2315_v16, %v827_v18 }
 0x86d   :  { %831 = vperm.xlu0 %2215, %v828_v19  }
 0x871   :  { %2218 = vset.pattern.permute.xlu0 %v2423_v20 }
 0x8db   :  { %v838_v26 = vpop.permute.xlu1 %837 }
 0x8ec   :  { %v832_v21 = vpop.permute.xlu0 %831 }
 0x8ed   :  { %v834_v23 = vmul.f32 %v832_v21, %v2677_v14 }
 0x8ef   :  { %v843_v25 = vrot.slane %v834_v23, %v2610_v9 }
 0x8f1   :  { %v844_v27 = vmul.f32 %v843_v25, %v838_v26 }
 0x8f3   :  { %v845_v28 = vsub.f32 %v2677_v14, %v844_v27  ;;  %v2427_v27 = vmov 13  }
 0x8f5   :  { %v846_v29 = vsel %vm513_vm12, %v843_v25, %v845_v28 }
 0x8f6   :  { %859 = vperm.xlu0 %2218, %v846_v29   ;;  %2316 = vrcp.f32 %v846_v29 }
 0x8fa   :  { %2220 = vset.pattern.permute.xlu0 %v2425_v55 }
 0x900   :  { %v2317_v30 = vpop.eup %2316 }
 0x901   :  { %v848_v31 = vmul.f32 %v2317_v30, %v846_v29 }
 0x903   :  { %v849_v32 = vsub.f32 2.0, %v848_v31 }
 0x905   :  { %v850_v33 = vmul.f32 %v2317_v30, %v849_v32  ;;  %v2704_v30 = vsub.s32 %v2597_v62, %v2564_v37 }
 0x907   :  { %853 = vperm.xlu1 %2217, %v850_v33   ;;  %vm709_vm6 = vcmp.eq.s32.totalorder %v2704_v30, 0  ;;  %vm1003_vm10 = vcmp.eq.s32.totalorder %v2704_v30, 8  ;;  %vm1320_vm5 = vcmp.eq.s32.totalorder %v2704_v30, 16 }
 0x90b   :  { %2219 = vset.pattern.permute.xlu1 %v2424_v34 }
 0x975   :  { %v860_v45 = vpop.permute.xlu0 %859 }
 0x986   :  { %v854_v40 = vpop.permute.xlu1 %853 }
 0x987   :  { %v856_v41 = vmul.f32 %v854_v40, %v846_v29 }
 0x989   :  { %v865_v44 = vrot.slane %v856_v41, %v2619_v22  ;;  %v1927_v41 = vsel %vm709_vm6, 1.0, %v2412_v7 }
 0x98b   :  { %v866_v46 = vmul.f32 %v865_v44, %v860_v45 }
 0x98d   :  { %v867_v47 = vsub.f32 %v846_v29, %v866_v46 }
 0x98f   :  { %v868_v48 = vsel %vm538_vm13, %v865_v44, %v867_v47 }
 0x990   :  { %2318 = vrcp.f32 %v868_v48 }
 0x99a   :  { %v2319_v49 = vpop.eup %2318 }
 0x99b   :  { %v870_v50 = vmul.f32 %v2319_v49, %v868_v48 }
 0x99d   :  { %v871_v51 = vsub.f32 2.0, %v870_v50 }
 0x99f   :  { %v872_v53 = vmul.f32 %v2319_v49, %v871_v51  ;;  %v2428_v51 = vmov 14  }
 0x9a1   :  { %875 = vperm.xlu1 %2219, %v872_v53  }
 0x9a5   :  { %881 = vperm.xlu1 %2219, %v868_v48  }
 0x9a9   :  { %2221 = vset.pattern.permute.xlu1 %v2425_v55 }
 0xa20   :  { %v876_v56 = vpop.permute.xlu1 %875 }
 0xa21   :  { %v878_v58 = vmul.f32 %v876_v56, %v868_v48 }
 0xa23   :  { %v887_v60 = vrot.slane %v878_v58, %v2626_v38 }
 0xa24   :  { %v882_v63 = vpop.permute.xlu1 %881 }
 0xa25   :  { %v888_v1 = vmul.f32 %v887_v60, %v882_v63 }
 0xa27   :  { %v889_v2 = vsub.f32 %v868_v48, %v888_v1 }
 0xa29   :  { %v890_v5 = vsel %vm563_vm14, %v887_v60, %v889_v2 }
 0xa2a   :  { %903 = vperm.xlu1 %2221, %v890_v5   ;;  %2320 = vrcp.f32 %v890_v5 }
 0xa2e   :  { %2222 = vset.pattern.permute.xlu1 %v2426_v12 }
 0xa34   :  { %v2321_v6 = vpop.eup %2320 }
 0xa35   :  { %v892_v43 = vmul.f32 %v2321_v6, %v890_v5 }
 0xa37   :  { %v893_v8 = vsub.f32 2.0, %v892_v43 }
 0xa39   :  { %v894_v11 = vmul.f32 %v2321_v6, %v893_v8 }
 0xa3b   :  { %897 = vperm.xlu0 %2220, %v894_v11   ;;  %v1934_v11 = vsel %vm1003_vm10, 1.0, %v2412_v7 }
 0xa3f   :  { %2223 = vset.pattern.permute.xlu0 %v2426_v12 }
 0xaa9   :  { %v904_v17 = vpop.permute.xlu1 %903 }
 0xaba   :  { %v898_v36 = vpop.permute.xlu0 %897 }
 0xabb   :  { %v900_v13 = vmul.f32 %v898_v36, %v890_v5 }
 0xabd   :  { %v909_v16 = vrot.slane %v900_v13, %v2633_v54  ;;  %v2430_v13 = vmov 15  }
 0xabf   :  { %v910_v18 = vmul.f32 %v909_v16, %v904_v17 }
 0xac1   :  { %v911_v19 = vsub.f32 %v890_v5, %v910_v18 }
 0xac3   :  { %v912_v20 = vsel %vm588_vm15, %v909_v16, %v911_v19 }
 0xac4   :  { %925 = vperm.xlu0 %2223, %v912_v20   ;;  %2322 = vrcp.f32 %v912_v20 }
 0xac8   :  { %2224 = vset.pattern.permute.xlu0 %v2427_v27 }
 0xace   :  { %v2323_v21 = vpop.eup %2322 }
 0xacf   :  { %v914_v23 = vmul.f32 %v2323_v21, %v912_v20 }
 0xad1   :  { %v915_v25 = vsub.f32 2.0, %v914_v23 }
 0xad3   :  { %v916_v26 = vmul.f32 %v2323_v21, %v915_v25 }
 0xad5   :  { %919 = vperm.xlu1 %2222, %v916_v26  }
 0xad9   :  { %486 = vrot.lane.b32.xlu1 %v2599_v0, %s2414_s2  ;;  %v2710_v0 = vsub.s32 %v2592_v59, %v2564_v37 }
 0xada   :  { %2225 = vset.pattern.permute.xlu1 %v2427_v27 }
 0xadb   :  { %vm710_vm8 = vcmp.eq.s32.totalorder %v2710_v0, 0  ;;  %vm1004_vm11 = vcmp.eq.s32.totalorder %v2710_v0, 8  ;;  %vm1321_vm6 = vcmp.eq.s32.totalorder %v2710_v0, 16 }
 0xadc   :  { %v1928_v37 = vsel %vm710_vm8, 1.0, %v2412_v7  ;;  %v1935_v12 = vsel %vm1004_vm11, 1.0, %v2412_v7 }
 0xadd   :  { %488 = vrot.lane.b32.xlu1 %v2594_v61, %s2414_s2  ;;  %v2233_v36 = vpack.i.bf16 %v1935_v12, %v1934_v11 }
 0xb43   :  { %v926_v32 = vpop.permute.xlu0 %925 }
 0xb54   :  { %v920_v28 = vpop.permute.xlu1 %919 }
 0xb55   :  { %v922_v29 = vmul.f32 %v920_v28, %v912_v20 }
 0xb57   :  { %v931_v31 = vrot.slane %v922_v29, %v2640_v10  ;;  %v2738_v29 = vsub.f32 %v2584_v52, %v2679_v15 }
 0xb58   :  { %v487_v33 = vpop.permute.xlu1 %486 }
 0xb59   :  { %v932_v34 = vmul.f32 %v931_v31, %v926_v32  ;;  %497 = vst.msk [vmem:[#allocation2 + $0x10] sm:$0xff] %vm494_vm7, %v487_v33 }
 0xb5b   :  { %v933_v61 = vsub.f32 %v912_v20, %v932_v34 }
 0xb5c   :  { %v489_v40 = vpop.permute.xlu1 %488 }
 0xb5d   :  { %498 = vst.msk [vmem:[#allocation2 + $0x18] sm:$0xff] %vm494_vm7, %v489_v40  ;;  %v934_v62 = vsel %vm613_vm0, %v931_v31, %v933_v61  ;;  %vm1002_vm7 = vcmp.eq.s32.totalorder %v2669_v4, 8 }
 0xb5e   :  { %947 = vperm.xlu1 %2225, %v934_v62   ;;  %2324 = vrcp.f32 %v934_v62  ;;  %v1933_v43 = vsel %vm1002_vm7, 1.0, %v2412_v7 }
 0xb60   :  { %v501_v44 = vld [vmem:[#allocation2 + $0x10] sm:$0xff] }
 0xb61   :  { %v721_v45 = vsub.f32 %v501_v44, %v1927_v41 }
 0xb62   :  { %2226 = vset.pattern.permute.xlu1 %v2428_v51 }
 0xb63   :  { %2077 = vmatprep.mubr.msk.f32.mxu1 %vm723_vm9, %v721_v45 }
 0xb64   :  { %v2720_v59 = vld [vmem:[#allocation2 + $0x18] sm:$0xff] }
 0xb65   :  { %v722_v46 = vsub.f32 %v2720_v59, %v1928_v37 }
 0xb67   :  { %2078 = vmatmul.mubr.msk.f32.vlgmr.msra.gmra.mrb[8].mxu1 %vm723_vm9, %v722_v46 }
 0xb68   :  { %v2325_v47 = vpop.eup %2324 }
 0xb69   :  { %v936_v48 = vmul.f32 %v2325_v47, %v934_v62 }
 0xb6b   :  { %v937_v49 = vsub.f32 2.0, %v936_v48 }
 0xb6d   :  { %v938_v50 = vmul.f32 %v2325_v47, %v937_v49 }
 0xb6f   :  { %941 = vperm.xlu0 %2224, %v938_v50  }
 0xb73   :  { %2227 = vset.pattern.permute.xlu0 %v2428_v51 }
 0xbdd   :  { %v948_v58 = vpop.permute.xlu1 %947 }
 0xbee   :  { %v942_v53 = vpop.permute.xlu0 %941 }
 0xbef   :  { %v944_v55 = vmul.f32 %v942_v53, %v934_v62 }
 0xbf1   :  { %v953_v56 = vrot.slane %v944_v55, %v2647_v24 }
 0xbf3   :  { %v954_v60 = vmul.f32 %v953_v56, %v948_v58 }
 0xbf5   :  { %v955_v63 = vsub.f32 %v934_v62, %v954_v60  ;;  %v2432_v60 = vmov 16  }
 0xbf7   :  { %v956_v1 = vsel %vm638_vm1, %v953_v56, %v955_v63 }
 0xbf8   :  { %969 = vperm.xlu0 %2227, %v956_v1   ;;  %2326 = vrcp.f32 %v956_v1 }
 0xbfc   :  { %2238 = vset.pattern.permute.xlu0 %v2430_v13 }
 0xc02   :  { %v2327_v2 = vpop.eup %2326 }
 0xc03   :  { %v958_v5 = vmul.f32 %v2327_v2, %v956_v1 }
 0xc05   :  { %v959_v6 = vsub.f32 2.0, %v958_v5 }
 0xc07   :  { %v960_v8 = vmul.f32 %v2327_v2, %v959_v6 }
 0xc09   :  { %963 = vperm.xlu1 %2226, %v960_v8  }
 0xc0d   :  { %2229 = vrot.lane.b32.xlu1 %v1933_v43, %s2429_s18 }
 0xc0e   :  { %2239 = vset.pattern.permute.xlu1 %v2430_v13 }
 0xc11   :  { %2234 = vrot.lane.b32.xlu1 %v2233_v36, %s2429_s18  ;;  %v2433_v36 = vmov 17  }
 0xc3a   :  { %v2079_v4 = vpop.f32.mrb[8].mxu1 }
 0xc3b   :  { %v812_v16 = vpop.f32.mrb[9].mxu1  ;;  %v2743_v15 = vsub.f32 %v2720_v59, %v2079_v4 }
 0xc3c   :  { %v823_v33 = vsub.f32 %v501_v44, %v812_v16 }
 0xc77   :  { %v970_v20 = vpop.permute.xlu0 %969 }
 0xc88   :  { %v964_v17 = vpop.permute.xlu1 %963 }
 0xc89   :  { %v966_v18 = vmul.f32 %v964_v17, %v956_v1 }
 0xc8b   :  { %v975_v19 = vrot.slane %v966_v18, %v2654_v42 }
 0xc8c   :  { %v2230_v21 = vpop.permute.xlu1 %2229 }
 0xc8d   :  { %v976_v23 = vmul.f32 %v975_v19, %v970_v20  ;;  %v2231_v26 = vunpack.i.l.bf16 %v2230_v21  ;;  %v2232_v41 = vunpack.i.h.bf16 %v2230_v21 }
 0xc8f   :  { %v977_v25 = vsub.f32 %v956_v1, %v976_v23  ;;  %v1029_v31 = vsub.f32 %v2738_v29, %v2231_v26  ;;  %v1030_v37 = vsub.f32 %v2677_v14, %v2232_v41 }
 0xc90   :  { %v2235_v27 = vpop.permute.xlu1 %2234 }
 0xc91   :  { %v978_v28 = vsel %vm663_vm3, %v975_v19, %v977_v25  ;;  %v2236_v32 = vunpack.i.l.bf16 %v2235_v27  ;;  %v2237_v52 = vunpack.i.h.bf16 %v2235_v27  ;;  %v2434_v27 = vmov 18  }
 0xc92   :  { %991 = vperm.xlu1 %2239, %v978_v28   ;;  %2328 = vrcp.f32 %v978_v28 }
 0xc93   :  { %v1031_v34 = vsub.f32 %v823_v33, %v2236_v32  ;;  %v1032_v46 = vsub.f32 %v2743_v15, %v2237_v52  ;;  %v2435_v52 = vmov 19  }
 0xc96   :  { %1037 = vrot.lane.b32.xlu1 %v1029_v31, %s2431_s19 }
 0xc97   :  { %2240 = vset.pattern.permute.xlu1 %v2432_v60 }
 0xc9a   :  { %1041 = vrot.lane.b32.xlu1 %v1031_v34, %s2431_s19 }
 0xc9c   :  { %v2329_v61 = vpop.eup %2328 }
 0xc9d   :  { %v980_v40 = vmul.f32 %v2329_v61, %v978_v28 }
 0xc9f   :  { %v981_v62 = vsub.f32 2.0, %v980_v40 }
 0xca1   :  { %v982_v45 = vmul.f32 %v2329_v61, %v981_v62 }
 0xca3   :  { %985 = vperm.xlu0 %2238, %v982_v45  }
 0xca7   :  { %1039 = vrot.lane.b32.xlu0 %v1030_v37, %s2431_s19 }
 0xca8   :  { %2241 = vset.pattern.permute.xlu0 %v2432_v60 }
 0xcab   :  { %1043 = vrot.lane.b32.xlu0 %v1032_v46, %s2431_s19 }
 0xd11   :  { %v992_v44 = vpop.permute.xlu1 %991 }
 0xd15   :  { %v1038_v47 = vpop.permute.xlu1 %1037 }
 0xd16   :  { %2082 = vmatprep.mubr.msk.f32.mxu0 %vm723_vm9, %v1038_v47 }
 0xd19   :  { %v1042_v59 = vpop.permute.xlu1 %1041 }
 0xd22   :  { %v986_v48 = vpop.permute.xlu0 %985 }
 0xd23   :  { %v988_v49 = vmul.f32 %v986_v48, %v978_v28 }
 0xd25   :  { %v997_v50 = vrot.slane %v988_v49, %v2663_v57 }
 0xd26   :  { %v1040_v55 = vpop.permute.xlu0 %1039 }
 0xd27   :  { %v998_v51 = vmul.f32 %v997_v50, %v992_v44 }
 0xd29   :  { %v999_v53 = vsub.f32 %v978_v28, %v998_v51 }
 0xd2a   :  { %v1044_v58 = vpop.permute.xlu0 %1043 }
 0xd2b   :  { %v1000_v56 = vsel %vm688_vm4, %v997_v50, %v999_v53 }
 0xd2c   :  { %2080 = vmatprep.subr.mxu0 %v1000_v56 }
 0xd2d   :  { %2081 = vmatpush3.msra.mxu0 %v1000_v56 }
 0xd2e   :  { %2083 = vmatmul.mubr.msk.f32.vlgmr.msra.gmra.mrb[8].mxu0 %vm723_vm9, %v1040_v55 }
 0xd2f   :  { %2085 = vmatprep.mubr.msk.f32.mxu0 %vm723_vm9, %v1042_v59 }
 0xd32   :  { %2086 = vmatmul.mubr.msk.f32.gmra.mrb[10].mxu0 %vm723_vm9, %v1044_v58  ;;  %v2436_v58 = vmov 20  }
 0xe01   :  { %v2753_v63 = vpop.f32.mrb[8].mxu0 }
 0xe02   :  { %v2755_v1 = vpop.f32.mrb[9].mxu0 }
 0xe05   :  { %v2757_v2 = vpop.f32.mrb[10].mxu0 }
 0xe06   :  { %v1129_v5 = vpop.f32.mrb[11].mxu0 }
 0xe07   :  { %v2759_v6 = vsub.f32 %v823_v33, %v1129_v5 }
 0xe09   :  { %1154 = vperm.xlu0 %2241, %v2759_v6   ;;  %2330 = vrcp.f32 %v2759_v6 }
 0xe0d   :  { %2243 = vset.pattern.permute.xlu0 %v2434_v27 }
 0xe13   :  { %v2331_v43 = vpop.eup %2330 }
 0xe14   :  { %v1143_v8 = vmul.f32 %v2331_v43, %v2759_v6 }
 0xe16   :  { %v1144_v11 = vsub.f32 2.0, %v1143_v8 }
 0xe18   :  { %v1145_v12 = vmul.f32 %v2331_v43, %v1144_v11 }
 0xe1a   :  { %1148 = vperm.xlu1 %2240, %v1145_v12  }
 0xe1e   :  { %2242 = vset.pattern.permute.xlu1 %v2433_v36 }
 0xe88   :  { %v1155_v17 = vpop.permute.xlu0 %1154 }
 0xe99   :  { %v1149_v13 = vpop.permute.xlu1 %1148 }
 0xe9a   :  { %v1151_v4 = vmul.f32 %v1149_v13, %v2759_v6 }
 0xe9c   :  { %v1160_v16 = vrot.slane %v1151_v4, %v2610_v9 }
 0xe9e   :  { %v1161_v18 = vmul.f32 %v1160_v16, %v1155_v17 }
 0xea0   :  { %v1162_v19 = vsub.f32 %v2759_v6, %v1161_v18  ;;  %v2437_v18 = vmov 21  }
 0xea2   :  { %v1163_v20 = vsel %vm513_vm12, %v1160_v16, %v1162_v19 }
 0xea3   :  { %2332 = vrcp.f32 %v1163_v20 }
 0xead   :  { %v2333_v21 = vpop.eup %2332 }
 0xeae   :  { %v1165_v23 = vmul.f32 %v2333_v21, %v1163_v20 }
 0xeb0   :  { %v1166_v25 = vsub.f32 2.0, %v1165_v23 }
 0xeb2   :  { %v1167_v26 = vmul.f32 %v2333_v21, %v1166_v25 }
 0xeb4   :  { %1170 = vperm.xlu1 %2242, %v1167_v26  }
 0xeb8   :  { %1176 = vperm.xlu1 %2242, %v1163_v20  }
 0xebc   :  { %2244 = vset.pattern.permute.xlu1 %v2434_v27 }
 0xf33   :  { %v1171_v28 = vpop.permute.xlu1 %1170 }
 0xf34   :  { %v1173_v31 = vmul.f32 %v1171_v28, %v1163_v20 }
 0xf36   :  { %v1182_v32 = vrot.slane %v1173_v31, %v2619_v22 }
 0xf37   :  { %v1177_v33 = vpop.permute.xlu1 %1176 }
 0xf38   :  { %v1183_v34 = vmul.f32 %v1182_v32, %v1177_v33 }
 0xf3a   :  { %v1184_v61 = vsub.f32 %v1163_v20, %v1183_v34  ;;  %v2438_v34 = vmov 22  }
 0xf3c   :  { %v1185_v40 = vsel %vm538_vm13, %v1182_v32, %v1184_v61 }
 0xf3d   :  { %1198 = vperm.xlu1 %2244, %v1185_v40   ;;  %2334 = vrcp.f32 %v1185_v40 }
 0xf41   :  { %2245 = vset.pattern.permute.xlu1 %v2435_v52 }
 0xf47   :  { %v2335_v62 = vpop.eup %2334 }
 0xf48   :  { %v1187_v41 = vmul.f32 %v2335_v62, %v1185_v40 }
 0xf4a   :  { %v1188_v45 = vsub.f32 2.0, %v1187_v41 }
 0xf4c   :  { %v1189_v37 = vmul.f32 %v2335_v62, %v1188_v45 }
 0xf4e   :  { %1192 = vperm.xlu0 %2243, %v1189_v37  }
 0xf52   :  { %2246 = vset.pattern.permute.xlu0 %v2435_v52 }
 0xfbc   :  { %v1199_v48 = vpop.permute.xlu1 %1198 }
 0xfcd   :  { %v1193_v46 = vpop.permute.xlu0 %1192 }
 0xfce   :  { %v1195_v44 = vmul.f32 %v1193_v46, %v1185_v40 }
 0xfd0   :  { %v1204_v47 = vrot.slane %v1195_v44, %v2626_v38 }
 0xfd2   :  { %v1205_v49 = vmul.f32 %v1204_v47, %v1199_v48 }
 0xfd4   :  { %v1206_v50 = vsub.f32 %v1185_v40, %v1205_v49  ;;  %v1940_v49 = vsel %vm1320_vm5, 1.0, %v2412_v7 }
 0xfd6   :  { %v1207_v51 = vsel %vm563_vm14, %v1204_v47, %v1206_v50  ;;  %v1941_v50 = vsel %vm1321_vm6, 1.0, %v2412_v7 }
 0xfd7   :  { %1220 = vperm.xlu0 %2246, %v1207_v51   ;;  %2336 = vrcp.f32 %v1207_v51 }
 0xfdb   :  { %2248 = vset.pattern.permute.xlu0 %v2437_v18 }
 0xfe1   :  { %v2337_v53 = vpop.eup %2336 }
 0xfe2   :  { %v1209_v55 = vmul.f32 %v2337_v53, %v1207_v51 }
 0xfe4   :  { %v1210_v56 = vsub.f32 2.0, %v1209_v55 }
 0xfe6   :  { %v1211_v59 = vmul.f32 %v2337_v53, %v1210_v56  ;;  %v2440_v53 = vmov 23  }
 0xfe8   :  { %1214 = vperm.xlu1 %2245, %v1211_v59  }
 0xfec   :  { %2247 = vset.pattern.permute.xlu1 %v2436_v58 }
0x1056   :  { %v1221_v8 = vpop.permute.xlu0 %1220 }
0x1067   :  { %v1215_v60 = vpop.permute.xlu1 %1214 }
0x1068   :  { %v1217_v5 = vmul.f32 %v1215_v60, %v1207_v51 }
0x106a   :  { %v1226_v43 = vrot.slane %v1217_v5, %v2633_v54 }
0x106c   :  { %v1227_v11 = vmul.f32 %v1226_v43, %v1221_v8 }
0x106e   :  { %v1228_v12 = vsub.f32 %v1207_v51, %v1227_v11  ;;  %v2257_v51 = vpack.i.bf16 %v1941_v50, %v1940_v49 }
0x1070   :  { %v1229_v36 = vsel %vm588_vm15, %v1226_v43, %v1228_v12  ;;  %v2794_v12 = vsub.f32 %v2738_v29, %v2755_v1 }
0x1071   :  { %2338 = vrcp.f32 %v1229_v36 }
0x107b   :  { %v2339_v13 = vpop.eup %2338 }
0x107c   :  { %v1231_v4 = vmul.f32 %v2339_v13, %v1229_v36 }
0x107e   :  { %v1232_v16 = vsub.f32 2.0, %v1231_v4 }
0x1080   :  { %v1233_v17 = vmul.f32 %v2339_v13, %v1232_v16 }
0x1082   :  { %1236 = vperm.xlu1 %2247, %v1233_v17  }
0x1086   :  { %1242 = vperm.xlu1 %2247, %v1229_v36  }
0x108a   :  { %2249 = vset.pattern.permute.xlu1 %v2437_v18 }
0x1101   :  { %v1237_v19 = vpop.permute.xlu1 %1236 }
0x1102   :  { %v1239_v20 = vmul.f32 %v1237_v19, %v1229_v36 }
0x1104   :  { %v1248_v21 = vrot.slane %v1239_v20, %v2640_v10 }
0x1105   :  { %v1243_v23 = vpop.permute.xlu1 %1242 }
0x1106   :  { %v1249_v25 = vmul.f32 %v1248_v21, %v1243_v23  ;;  %v1141_v23 = vsub.f32 %v2743_v15, %v2757_v2 }
0x1108   :  { %v1250_v26 = vsub.f32 %v1229_v36, %v1249_v25 }
0x110a   :  { %v1251_v27 = vsel %vm613_vm0, %v1248_v21, %v1250_v26  ;;  %v2800_v21 = vsub.f32 %v2677_v14, %v2753_v63 }
0x110b   :  { %1264 = vperm.xlu1 %2249, %v1251_v27   ;;  %2340 = vrcp.f32 %v1251_v27 }
0x110f   :  { %2250 = vset.pattern.permute.xlu1 %v2438_v34 }
0x1115   :  { %v2341_v28 = vpop.eup %2340 }
0x1116   :  { %v1253_v31 = vmul.f32 %v2341_v28, %v1251_v27 }
0x1118   :  { %v1254_v32 = vsub.f32 2.0, %v1253_v31 }
0x111a   :  { %v1255_v33 = vmul.f32 %v2341_v28, %v1254_v32 }
0x111c   :  { %1258 = vperm.xlu0 %2248, %v1255_v33  }
0x1120   :  { %2251 = vset.pattern.permute.xlu0 %v2438_v34 }
0x118a   :  { %v1265_v41 = vpop.permute.xlu1 %1264 }
0x119b   :  { %v1259_v61 = vpop.permute.xlu0 %1258 }
0x119c   :  { %v1261_v40 = vmul.f32 %v1259_v61, %v1251_v27  ;;  %v2442_v61 = vmov 24  }
0x119e   :  { %v1270_v62 = vrot.slane %v1261_v40, %v2647_v24 }
0x11a0   :  { %v1271_v45 = vmul.f32 %v1270_v62, %v1265_v41 }
0x11a2   :  { %v1272_v37 = vsub.f32 %v1251_v27, %v1271_v45 }
0x11a4   :  { %v1273_v52 = vsel %vm638_vm1, %v1270_v62, %v1272_v37 }
0x11a5   :  { %1286 = vperm.xlu0 %2251, %v1273_v52   ;;  %2342 = vrcp.f32 %v1273_v52 }
0x11a9   :  { %2262 = vset.pattern.permute.xlu0 %v2440_v53 }
0x11af   :  { %v2343_v46 = vpop.eup %2342 }
0x11b0   :  { %v1275_v44 = vmul.f32 %v2343_v46, %v1273_v52 }
0x11b2   :  { %v1276_v47 = vsub.f32 2.0, %v1275_v44 }
0x11b4   :  { %v1277_v48 = vmul.f32 %v2343_v46, %v1276_v47 }
0x11b6   :  { %1280 = vperm.xlu1 %2250, %v1277_v48   ;;  %v2443_v48 = vmov 25  }
0x11ba   :  { %2253 = vrot.lane.b32.xlu1 %v2412_v7, %s2439_s20 }
0x11bb   :  { %2263 = vset.pattern.permute.xlu1 %v2440_v53 }
0x11be   :  { %2258 = vrot.lane.b32.xlu1 %v2257_v51, %s2439_s20 }
0x1224   :  { %v1287_v30 = vpop.permute.xlu0 %1286 }
0x1235   :  { %v1281_v55 = vpop.permute.xlu1 %1280 }
0x1236   :  { %v1283_v56 = vmul.f32 %v1281_v55, %v1273_v52 }
0x1238   :  { %v1292_v59 = vrot.slane %v1283_v56, %v2654_v42 }
0x1239   :  { %v2254_v58 = vpop.permute.xlu1 %2253 }
0x123a   :  { %v1293_v60 = vmul.f32 %v1292_v59, %v1287_v30  ;;  %v2255_v43 = vunpack.i.l.bf16 %v2254_v58  ;;  %v2256_v19 = vunpack.i.h.bf16 %v2254_v58 }
0x123c   :  { %v1294_v5 = vsub.f32 %v1273_v52, %v1293_v60  ;;  %v1346_v36 = vsub.f32 %v2794_v12, %v2255_v43  ;;  %v1347_v29 = vsub.f32 %v2800_v21, %v2256_v19  ;;  %v2444_v43 = vmov 26  }
0x123d   :  { %v2259_v8 = vpop.permute.xlu1 %2258 }
0x123e   :  { %v1295_v11 = vsel %vm663_vm3, %v1292_v59, %v1294_v5  ;;  %v2260_v13 = vunpack.i.l.bf16 %v2259_v8  ;;  %v2261_v1 = vunpack.i.h.bf16 %v2259_v8 }
0x123f   :  { %1308 = vperm.xlu1 %2263, %v1295_v11   ;;  %2344 = vrcp.f32 %v1295_v11 }
0x1240   :  { %v1348_v4 = vsub.f32 %v2759_v6, %v2260_v13  ;;  %v1349_v25 = vsub.f32 %v1141_v23, %v2261_v1 }
0x1243   :  { %1354 = vrot.lane.b32.xlu1 %v1346_v36, %s2441_s21 }
0x1244   :  { %2264 = vset.pattern.permute.xlu1 %v2442_v61 }
0x1247   :  { %1358 = vrot.lane.b32.xlu1 %v1348_v4, %s2441_s21 }
0x1249   :  { %v2345_v16 = vpop.eup %2344 }
0x124a   :  { %v1297_v17 = vmul.f32 %v2345_v16, %v1295_v11 }
0x124c   :  { %v1298_v18 = vsub.f32 2.0, %v1297_v17 }
0x124e   :  { %v1299_v20 = vmul.f32 %v2345_v16, %v1298_v18 }
0x1250   :  { %1302 = vperm.xlu0 %2262, %v1299_v20  }
0x1254   :  { %1356 = vrot.lane.b32.xlu0 %v1347_v29, %s2441_s21  ;;  %v2445_v29 = vmov 27  }
0x1255   :  { %2265 = vset.pattern.permute.xlu0 %v2442_v61 }
0x1258   :  { %1360 = vrot.lane.b32.xlu0 %v1349_v25, %s2441_s21 }
0x12be   :  { %v1309_v26 = vpop.permute.xlu1 %1308 }
0x12c2   :  { %v1355_v27 = vpop.permute.xlu1 %1354 }
0x12c3   :  { %2090 = vmatprep.mubr.msk.f32.mxu1 %vm723_vm9, %v1355_v27 }
0x12c6   :  { %v1359_v15 = vpop.permute.xlu1 %1358 }
0x12cf   :  { %v1303_v28 = vpop.permute.xlu0 %1302 }
0x12d0   :  { %v1305_v31 = vmul.f32 %v1303_v28, %v1295_v11 }
0x12d2   :  { %v1314_v32 = vrot.slane %v1305_v31, %v2663_v57 }
0x12d3   :  { %v1357_v33 = vpop.permute.xlu0 %1356 }
0x12d4   :  { %v1315_v14 = vmul.f32 %v1314_v32, %v1309_v26 }
0x12d6   :  { %v1316_v63 = vsub.f32 %v1295_v11, %v1315_v14 }
0x12d7   :  { %v1361_v2 = vpop.permute.xlu0 %1360 }
0x12d8   :  { %v1317_v34 = vsel %vm688_vm4, %v1314_v32, %v1316_v63 }
0x12d9   :  { %2088 = vmatprep.subr.mxu1 %v1317_v34 }
0x12da   :  { %2089 = vmatpush3.msra.mxu1 %v1317_v34 }
0x12db   :  { %2091 = vmatmul.mubr.msk.f32.vlgmr.msra.gmra.mrb[10].mxu1 %vm723_vm9, %v1357_v33  ;;  %2151 = vmatprep.subr.bf16.mxu1 %v2410_v3  ;;  %v2446_v33 = vmov 28  }
0x12dc   :  { %2093 = vmatprep.mubr.msk.f32.mxu1 %vm723_vm9, %v1359_v15 }
0x12df   :  { %2094 = vmatmul.mubr.msk.f32.gmra.mrb[12].mxu1 %vm723_vm9, %v1361_v2 }
0x12e0   :  { %2112 = vmatprep.mubr.msk.f32.mxu1 %vm2411_vm2, %v2412_v7  ;;  %vm1638_vm2 = vcmp.eq.s32.totalorder %v2710_v0, 24 }
0x13ae   :  { %v2815_v40 = vpop.f32.mrb[10].mxu1 }
0x13af   :  { %v2817_v62 = vpop.f32.mrb[11].mxu1 }
0x13b2   :  { %v2095_v41 = vpop.f32.mrb[12].mxu1 }
0x13b3   :  { %v2819_v45 = vsub.f32 %v1141_v23, %v2095_v41  ;;  %v2821_v37 = vpop.f32.mrb[13].mxu1 }
0x13b5   :  { %1471 = vperm.xlu0 %2265, %v2819_v45   ;;  %2346 = vrcp.f32 %v2819_v45 }
0x13b9   :  { %2267 = vset.pattern.permute.xlu0 %v2444_v43 }
0x13bf   :  { %v2347_v52 = vpop.eup %2346 }
0x13c0   :  { %v1460_v46 = vmul.f32 %v2347_v52, %v2819_v45 }
0x13c2   :  { %v1461_v44 = vsub.f32 2.0, %v1460_v46 }
0x13c4   :  { %v1462_v47 = vmul.f32 %v2347_v52, %v1461_v44 }
0x13c6   :  { %1465 = vperm.xlu1 %2264, %v1462_v47  }
0x13ca   :  { %2266 = vset.pattern.permute.xlu1 %v2443_v48 }
0x1434   :  { %v1472_v53 = vpop.permute.xlu0 %1471 }
0x1445   :  { %v1466_v49 = vpop.permute.xlu1 %1465 }
0x1446   :  { %v1468_v50 = vmul.f32 %v1466_v49, %v2819_v45  ;;  %v2447_v49 = vmov 29  }
0x1448   :  { %v1477_v51 = vrot.slane %v1468_v50, %v2610_v9 }
0x144a   :  { %v1478_v55 = vmul.f32 %v1477_v51, %v1472_v53 }
0x144c   :  { %v1479_v56 = vsub.f32 %v2819_v45, %v1478_v55 }
0x144e   :  { %v1480_v59 = vsel %vm513_vm12, %v1477_v51, %v1479_v56  ;;  %vm1788_vm12 = vcmask 15360  }
0x144f   :  { %2348 = vrcp.f32 %v1480_v59 }
0x1459   :  { %v2349_v30 = vpop.eup %2348 }
0x145a   :  { %v1482_v58 = vmul.f32 %v2349_v30, %v1480_v59 }
0x145c   :  { %v1483_v60 = vsub.f32 2.0, %v1482_v58 }
0x145e   :  { %v1484_v5 = vmul.f32 %v2349_v30, %v1483_v60 }
0x1460   :  { %1487 = vperm.xlu1 %2266, %v1484_v5  }
0x1464   :  { %1493 = vperm.xlu1 %2266, %v1480_v59  }
0x1468   :  { %2268 = vset.pattern.permute.xlu1 %v2444_v43  ;;  %v2448_v43 = vmov 30  }
0x14df   :  { %v1488_v8 = vpop.permute.xlu1 %1487 }
0x14e0   :  { %v1490_v11 = vmul.f32 %v1488_v8, %v1480_v59 }
0x14e2   :  { %v1499_v9 = vrot.slane %v1490_v11, %v2619_v22 }
0x14e3   :  { %v1494_v36 = vpop.permute.xlu1 %1493 }
0x14e4   :  { %v1500_v13 = vmul.f32 %v1499_v9, %v1494_v36 }
0x14e6   :  { %v1501_v4 = vsub.f32 %v1480_v59, %v1500_v13 }
0x14e8   :  { %v1502_v16 = vsel %vm538_vm13, %v1499_v9, %v1501_v4  ;;  %vm2153_vm13 = vmpackc.low %vm1788_vm12, %vm1788_vm12 }
0x14e9   :  { %1515 = vperm.xlu1 %2268, %v1502_v16   ;;  %2350 = vrcp.f32 %v1502_v16 }
0x14ed   :  { %2269 = vset.pattern.permute.xlu1 %v2445_v29 }
0x14f3   :  { %v2351_v17 = vpop.eup %2350 }
0x14f4   :  { %v1504_v18 = vmul.f32 %v2351_v17, %v1502_v16 }
0x14f6   :  { %v1505_v19 = vsub.f32 2.0, %v1504_v18 }
0x14f8   :  { %v1506_v20 = vmul.f32 %v2351_v17, %v1505_v19 }
0x14fa   :  { %1509 = vperm.xlu0 %2267, %v1506_v20   ;;  %v1946_v20 = vsel %vm1638_vm2, 1.0, %v2412_v7 }
0x14fe   :  { %2270 = vset.pattern.permute.xlu0 %v2445_v29 }
0x1568   :  { %v1516_v25 = vpop.permute.xlu1 %1515 }
0x1579   :  { %v1510_v1 = vpop.permute.xlu0 %1509 }
0x157a   :  { %v1512_v23 = vmul.f32 %v1510_v1, %v1502_v16 }
0x157c   :  { %v1521_v22 = vrot.slane %v1512_v23, %v2626_v38 }
0x157e   :  { %v1522_v26 = vmul.f32 %v1521_v22, %v1516_v25 }
0x1580   :  { %v1523_v27 = vsub.f32 %v1502_v16, %v1522_v26 }
0x1582   :  { %v1524_v28 = vsel %vm563_vm14, %v1521_v22, %v1523_v27 }
0x1583   :  { %1537 = vperm.xlu0 %2270, %v1524_v28   ;;  %2352 = vrcp.f32 %v1524_v28 }
0x1587   :  { %2272 = vset.pattern.permute.xlu0 %v2447_v49 }
0x158d   :  { %v2353_v31 = vpop.eup %2352 }
0x158e   :  { %v1526_v32 = vmul.f32 %v2353_v31, %v1524_v28 }
0x1590   :  { %v1527_v14 = vsub.f32 2.0, %v1526_v32 }
0x1592   :  { %v1528_v63 = vmul.f32 %v2353_v31, %v1527_v14 }
0x1594   :  { %1531 = vperm.xlu1 %2269, %v1528_v63   ;;  %v1457_v63 = vsub.f32 %v2759_v6, %v2821_v37 }
0x1598   :  { %2271 = vset.pattern.permute.xlu1 %v2446_v33 }
0x1602   :  { %v1538_v38 = vpop.permute.xlu0 %1537 }
0x1613   :  { %v1532_v34 = vpop.permute.xlu1 %1531 }
0x1614   :  { %v1534_v15 = vmul.f32 %v1532_v34, %v1524_v28 }
0x1616   :  { %v1543_v2 = vrot.slane %v1534_v15, %v2633_v54 }
0x1618   :  { %v1544_v61 = vmul.f32 %v1543_v2, %v1538_v38 }
0x161a   :  { %v1545_v41 = vsub.f32 %v1524_v28, %v1544_v61  ;;  %v1456_v61 = vsub.f32 %v2800_v21, %v2815_v40 }
0x161c   :  { %v1546_v52 = vsel %vm588_vm15, %v1543_v2, %v1545_v41 }
0x161d   :  { %2354 = vrcp.f32 %v1546_v52 }
0x1627   :  { %v2355_v46 = vpop.eup %2354 }
0x1628   :  { %v1548_v44 = vmul.f32 %v2355_v46, %v1546_v52 }
0x162a   :  { %v1549_v47 = vsub.f32 2.0, %v1548_v44 }
0x162c   :  { %v1550_v48 = vmul.f32 %v2355_v46, %v1549_v47 }
0x162e   :  { %1553 = vperm.xlu1 %2271, %v1550_v48  }
0x1632   :  { %1559 = vperm.xlu1 %2271, %v1546_v52  }
0x1636   :  { %2273 = vset.pattern.permute.xlu1 %v2447_v49 }
0x16ad   :  { %v1554_v50 = vpop.permute.xlu1 %1553 }
0x16ae   :  { %v1556_v51 = vmul.f32 %v1554_v50, %v1546_v52 }
0x16b0   :  { %v1565_v54 = vrot.slane %v1556_v51, %v2640_v10 }
0x16b1   :  { %v1560_v53 = vpop.permute.xlu1 %1559 }
0x16b2   :  { %v1566_v55 = vmul.f32 %v1565_v54, %v1560_v53 }
0x16b4   :  { %v1567_v56 = vsub.f32 %v1546_v52, %v1566_v55 }
0x16b6   :  { %v1568_v59 = vsel %vm613_vm0, %v1565_v54, %v1567_v56 }
0x16b7   :  { %1581 = vperm.xlu1 %2273, %v1568_v59   ;;  %2356 = vrcp.f32 %v1568_v59 }
0x16bb   :  { %2274 = vset.pattern.permute.xlu1 %v2448_v43 }
0x16c1   :  { %v2357_v30 = vpop.eup %2356 }
0x16c2   :  { %v1570_v58 = vmul.f32 %v2357_v30, %v1568_v59 }
0x16c4   :  { %v1571_v60 = vsub.f32 2.0, %v1570_v58 }
0x16c6   :  { %v1572_v5 = vmul.f32 %v2357_v30, %v1571_v60 }
0x16c8   :  { %1575 = vperm.xlu0 %2272, %v1572_v5  }
0x16cc   :  { %2275 = vset.pattern.permute.xlu0 %v2448_v43 }
0x1736   :  { %v1582_v9 = vpop.permute.xlu1 %1581 }
0x1747   :  { %v1576_v8 = vpop.permute.xlu0 %1575 }
0x1748   :  { %v1578_v11 = vmul.f32 %v1576_v8, %v1568_v59 }
0x174a   :  { %v1587_v10 = vrot.slane %v1578_v11, %v2647_v24  ;;  %v2450_v24 = vmov 31  }
0x174c   :  { %v1588_v36 = vmul.f32 %v1587_v10, %v1582_v9 }
0x174e   :  { %v1589_v13 = vsub.f32 %v1568_v59, %v1588_v36 }
0x1750   :  { %v1590_v4 = vsel %vm638_vm1, %v1587_v10, %v1589_v13 }
0x1751   :  { %1603 = vperm.xlu0 %2275, %v1590_v4   ;;  %2358 = vrcp.f32 %v1590_v4 }
0x1755   :  { %2286 = vset.pattern.permute.xlu0 %v2450_v24 }
0x175b   :  { %v2359_v16 = vpop.eup %2358 }
0x175c   :  { %v1592_v17 = vmul.f32 %v2359_v16, %v1590_v4 }
0x175e   :  { %v1593_v18 = vsub.f32 2.0, %v1592_v17 }
0x1760   :  { %v1594_v19 = vmul.f32 %v2359_v16, %v1593_v18 }
0x1762   :  { %1597 = vperm.xlu1 %2274, %v1594_v19  }
0x1766   :  { %2277 = vrot.lane.b32.xlu1 %v2412_v7, %s2449_s22  ;;  %v1455_v7 = vsub.f32 %v2794_v12, %v2817_v62 }
0x1767   :  { %2287 = vset.pattern.permute.xlu1 %v2450_v24 }
0x176a   :  { %2282 = vrot.lane.b32.xlu1 %v1946_v20, %s2449_s22 }
0x17d0   :  { %v1604_v22 = vpop.permute.xlu0 %1603 }
0x17e1   :  { %v1598_v29 = vpop.permute.xlu1 %1597 }
0x17e2   :  { %v1600_v1 = vmul.f32 %v1598_v29, %v1590_v4 }
0x17e4   :  { %v1609_v23 = vrot.slane %v1600_v1, %v2654_v42 }
0x17e5   :  { %v2278_v25 = vpop.permute.xlu1 %2277 }
0x17e6   :  { %v1610_v26 = vmul.f32 %v1609_v23, %v1604_v22  ;;  %v2279_v28 = vunpack.i.l.bf16 %v2278_v25  ;;  %v2280_v2 = vunpack.i.h.bf16 %v2278_v25 }
0x17e8   :  { %v1611_v27 = vsub.f32 %v1590_v4, %v1610_v26  ;;  %v1663_v32 = vsub.f32 %v1455_v7, %v2279_v28  ;;  %v1664_v12 = vsub.f32 %v1456_v61, %v2280_v2 }
0x17e9   :  { %v2283_v0 = vpop.permute.xlu1 %2282 }
0x17ea   :  { %v1612_v31 = vsel %vm663_vm3, %v1609_v23, %v1611_v27  ;;  %v2284_v14 = vunpack.i.l.bf16 %v2283_v0  ;;  %v2285_v62 = vunpack.i.h.bf16 %v2283_v0 }
0x17eb   :  { %1625 = vperm.xlu1 %2287, %v1612_v31   ;;  %2360 = vrcp.f32 %v1612_v31 }
0x17ec   :  { %v1665_v42 = vsub.f32 %v1457_v63, %v2284_v14  ;;  %v1666_v41 = vsub.f32 %v2819_v45, %v2285_v62 }
0x17ef   :  { %1671 = vrot.lane.b32.xlu1 %v1663_v32, %s2451_s23 }
0x17f3   :  { %1675 = vrot.lane.b32.xlu1 %v1665_v42, %s2451_s23 }
0x17f5   :  { %v2361_v33 = vpop.eup %2360 }
0x17f6   :  { %v1614_v34 = vmul.f32 %v2361_v33, %v1612_v31 }
0x17f8   :  { %v1615_v15 = vsub.f32 2.0, %v1614_v34 }
0x17fa   :  { %v1616_v38 = vmul.f32 %v2361_v33, %v1615_v15 }
0x17fc   :  { %1619 = vperm.xlu0 %2286, %v1616_v38  }
0x1800   :  { %1673 = vrot.lane.b32.xlu0 %v1664_v12, %s2451_s23 }
0x1804   :  { %1677 = vrot.lane.b32.xlu0 %v1666_v41, %s2451_s23 }
0x186a   :  { %v1626_v6 = vpop.permute.xlu1 %1625 }
0x186e   :  { %v1672_v37 = vpop.permute.xlu1 %1671 }
0x186f   :  { %2098 = vmatprep.mubr.msk.f32.mxu0 %vm723_vm9, %v1672_v37 }
0x1872   :  { %v1676_v40 = vpop.permute.xlu1 %1675 }
0x187b   :  { %v1620_v52 = vpop.permute.xlu0 %1619 }
0x187c   :  { %v1622_v46 = vmul.f32 %v1620_v52, %v1612_v31 }
0x187e   :  { %v1631_v44 = vrot.slane %v1622_v46, %v2663_v57 }
0x187f   :  { %v1674_v49 = vpop.permute.xlu0 %1673 }
0x1880   :  { %v1632_v47 = vmul.f32 %v1631_v44, %v1626_v6 }
0x1882   :  { %v1633_v48 = vsub.f32 %v1612_v31, %v1632_v47 }
0x1883   :  { %v1678_v50 = vpop.permute.xlu0 %1677 }
0x1884   :  { %v1634_v21 = vsel %vm688_vm4, %v1631_v44, %v1633_v48 }
0x1885   :  { %2096 = vmatprep.subr.mxu0 %v1634_v21 }
0x1886   :  { %2097 = vmatpush3.msra.mxu0 %v1634_v21 }
0x1887   :  { %2099 = vmatmul.mubr.msk.f32.vlgmr.msra.gmra.mrb[12].mxu0 %vm723_vm9, %v1674_v49 }
0x1888   :  { %2101 = vmatprep.mubr.msk.f32.mxu0 %vm723_vm9, %v1676_v40 }
0x188b   :  { %2102 = vmatmul.mubr.msk.f32.gmra.mrb[14].mxu0 %vm723_vm9, %v1678_v50 }
0x195a   :  { %v2100_v51 = vpop.f32.mrb[12].mxu0 }
0x195b   :  { %v1773_v54 = vsub.f32 %v1456_v61, %v2100_v51  ;;  %v1753_v53 = vpop.f32.mrb[13].mxu0 }
0x195c   :  { %v1772_v57 = vsub.f32 %v1455_v7, %v1753_v53 }
0x195e   :  { %v2288_v55 = vpack.i.bf16 %v1773_v54, %v1772_v57  ;;  %v2103_v56 = vpop.f32.mrb[14].mxu0 }
0x195f   :  { %v1775_v59 = vsub.f32 %v2819_v45, %v2103_v56  ;;  %v1763_v35 = vpop.f32.mrb[15].mxu0 }
0x1960   :  { %v1774_v30 = vsub.f32 %v1457_v63, %v1763_v35  ;;  %2289 = vrot.lane.b32.xlu1 %v2288_v55, %s2452_s24 }
0x1962   :  { %v2293_v58 = vpack.i.bf16 %v1775_v59, %v1774_v30 }
0x1964   :  { %2294 = vrot.lane.b32.xlu0 %v2293_v58, %s2452_s24 }
0x19d2   :  { %v2290_v60 = vpop.permute.xlu1 %2289 }
0x19d3   :  { %v2292_v5 = vunpack.i.h.bf16 %v2290_v60  ;;  %v2291_v43 = vunpack.i.l.bf16 %v2290_v60 }
0x19d5   :  { %v2152_v8 = vpack.c.bf16 %v2292_v5, %v2291_v43 }
0x19d6   :  { %v2295_v11 = vpop.permute.xlu0 %2294 }
0x19d7   :  { %2154 = vmatpush3.bf16.xpose.msk.msra.mxu1 %vm2153_vm13, %v2152_v8  ;;  %v2297_v10 = vunpack.i.h.bf16 %v2295_v11  ;;  %v2296_v9 = vunpack.i.l.bf16 %v2295_v11 }
0x19d8   :  { %2155 = vmatprep.subr.bf16.mxu1 %v2410_v3 }
0x19d9   :  { %v2156_v36 = vpack.c.bf16 %v2297_v10, %v2296_v9 }
0x19df   :  { %2158 = vmatpush3.bf16.xpose.msk.msra.mxu1 %vm2153_vm13, %v2156_v36 }
0x19e6   :  { %2113 = vmatmul.mubr.msk.f32.vlgmr.msra.gmra.mrb[14].mxu1 %vm1788_vm12, %v2572_v39 }
0x19e7   :  { %2373 = shalt.err (!%p2370_p4)
}
0x19e8   :  { %s2374_s30 = scalar_lea.hbm %s2898_s5, 32 }
0x19e9   :  { %p2375_p5 = scmp.ne.s32.totalorder %s2898_s5, %s2374_s30  ;;  %p2378_p6 = scmp.lt.u32.totalorder %s2374_s30, %s2898_s5 }
0x19eb   :  { %p2380_p7 = pnand %p2378_p6, %p2375_p5 }
0x19ed   :  { %2383 = shalt.err (!%p2380_p7)
}
0x19ee   :  { %1891 = dma.vmem_to_hbm [thread:$0]  %s1889_s26, 32, %s2898_s5, [#allocation6]   ;;  %vm1870_vm9 = vcmask 254976  }
0x19ef   :  { %s2454_s12 = smov [#allocation3]  }
0x19f0   :  { %s1878_s3 = sshll.u32 %s2454_s12, 4  ;;  %s1879_s3 = int_to_ptr.vmem [resolvable:$true] %s1878_s3 }
0x19f1   :  { %s2384_s13 = scalar_lea.vmem %s1879_s3, 32  ;;  %p2389_p9 = scmp.lt.s32.totalorder %s1879_s3, %s1879_s3 }
0x19f2   :  { %p2385_p8 = scmp.ne.s32.totalorder %s1879_s3, %s2384_s13  ;;  %p2390_p10 = scmp.lt.s32.totalorder %s2384_s13, %s2384_s13 }
0x19f4   :  { %p2391_p11 = por %p2390_p10, %p2389_p9 }
0x19f6   :  { %p2392_p12 = pnand %p2391_p11, %p2385_p8 }
0x1ab9   :  { %v1866_v3 = vpop.f32.mrb[14].mxu1 }
0x1aba   :  { %v2114_v39 = vpop.f32.mrb[15].mxu1  ;;  %1871 = vst.msk [vmem:[#allocation3] sm:$0x3] %vm1870_vm9, %v1866_v3 }
0x1abb   :  { %2395 = shalt.err (!%p2392_p12)
}
0x1abc   :  { %s2396_s16 = scalar_lea.hbm %s2897_s4, 32 }
0x1abd   :  { %p2397_p13 = scmp.ne.s32.totalorder %s2897_s4, %s2396_s16  ;;  %p2400_p0 = scmp.lt.u32.totalorder %s2396_s16, %s2897_s4 }
0x1abf   :  { %p2402_p1 = pnand %p2400_p0, %p2397_p13 }
0x1ac1   :  { %2405 = shalt.err (!%p2402_p1)
}
0x1ac2   :  { %1881 = dma.vmem_to_hbm [thread:$0]  %s1879_s3, 32, %s2897_s4, [#allocation4]  }
0x1ac3   :  { %2406 = dma.done.wait [#allocation4], 32  }
0x1ac4   :  { %2407 = vsyncadd [#allocation4], 4294967264 }
0x1ac5   :  { %2408 = dma.done.wait [#allocation6], 32  }
0x1ac6   :  { %2409 = vsyncadd [#allocation6], 4294967264 }
0x1ac7   :  { %1898 = vsyncpa [#allocation4], 1 }
0x1ac8   :  { %1899 = vsyncpa [#allocation6], 1 }

</bundles_post_ra>
